<compile_context>
chip_gen: v5e
topology: v5e:2x2
jax: 0.10.0
libtpu: 0.0.40
codegen_flags: <defaults>
</compile_context>

<pallas_src>
import functools

import jax
import jax.numpy as jnp
from jax.experimental import pallas as pl
from jax.experimental.pallas import tpu as pltpu

IN_F = 784              # input features, kept un-padded (full-dim BlockSpec)
HID, HID_P = 100, 128   # hidden 100 -> 128 lanes (zero-padded weights)
OUT, OUT_P = 10, 16     # 10 classes stored in a 16-lane f32 output slab

NEG_INF = -1e30         # finite "minus infinity" for padded class lanes


def mnist_mlp_kernel(x_ref, w1_ref, b1_ref, w2_ref, b2_ref, w3_ref, b3_ref, o_ref):
    """Fused MLP + softmax on one (TB, 784) batch tile. Weights stay VMEM-resident."""
    # Cast activations to bf16 in-kernel (input stays f32/bf16 in HBM as provided).
    x = x_ref[...].astype(jnp.bfloat16)                                   # (TB, 784)

    # Linear(784, 100) + ReLU   (bf16 MXU, f32 accumulation)
    h1 = jnp.dot(x, w1_ref[...], preferred_element_type=jnp.float32) + b1_ref[...]
    h1 = jnp.maximum(h1, 0.0).astype(jnp.bfloat16)                        # (TB, 128)

    # Linear(100, 100) + ReLU
    h2 = jnp.dot(h1, w2_ref[...], preferred_element_type=jnp.float32) + b2_ref[...]
    h2 = jnp.maximum(h2, 0.0).astype(jnp.bfloat16)                        # (TB, 128)

    # Linear(100, 10); padded class lanes carry bias -1e30 -> exp() == 0 below.
    logits = jnp.dot(h2, w3_ref[...], preferred_element_type=jnp.float32) + b3_ref[...]

    # Numerically stable softmax over the last axis (exact divide: kernel is
    # DMA-bound so the EUP/VALU slack makes the precise reciprocal free).
    m = jnp.max(logits, axis=-1, keepdims=True)
    e = jnp.exp(logits - m)
    o_ref[...] = e / jnp.sum(e, axis=-1, keepdims=True)                   # (TB, 16) f32


def _round_up(n, m):
    return (n + m - 1) // m * m


def _pick_batch_tile(B, tb):
    """Batch tile: multiple of 128, <= tb, and >=2 grid steps when possible
    so the "parallel" grid axis can shard across v7x's two TensorCores."""
    if B <= 128:
        return 128
    if _round_up(B, 128) <= tb:
        # Whole batch would fit one tile -> split in two for megacore.
        return _round_up(pl.cdiv(B, 2), 128)
    return tb


def init_params(key):
    """PyTorch nn.Linear-style init: U(-1/sqrt(fan_in), 1/sqrt(fan_in)). W is (in, out)."""
    dims = [(IN_F, HID), (HID, HID), (HID, OUT)]
    params = []
    for fan_in, fan_out in dims:
        key, kw, kb = jax.random.split(key, 3)
        bound = 1.0 / jnp.sqrt(fan_in)
        w = jax.random.uniform(kw, (fan_in, fan_out), jnp.float32, -bound, bound)
        b = jax.random.uniform(kb, (1, fan_out), jnp.float32, -bound, bound)
        params += [w, b]
    return tuple(params)


def prepare_params(params):
    """Pad params to lane-dense shapes; weights -> bf16, biases stay f32."""
    w1, b1, w2, b2, w3, b3 = params
    # w1 keeps its full 784-long contraction dim (matches the un-padded x block).
    w1p = jnp.zeros((IN_F, HID_P), jnp.float32).at[:, :HID].set(w1).astype(jnp.bfloat16)
    b1p = jnp.zeros((1, HID_P), jnp.float32).at[:, :HID].set(b1)
    w2p = jnp.zeros((HID_P, HID_P), jnp.float32).at[:HID, :HID].set(w2).astype(jnp.bfloat16)
    b2p = jnp.zeros((1, HID_P), jnp.float32).at[:, :HID].set(b2)
    w3p = jnp.zeros((HID_P, OUT_P), jnp.float32).at[:HID, :OUT].set(w3).astype(jnp.bfloat16)
    # Padded class lanes get a finite -1e30 so their softmax contribution is exactly 0.
    b3p = jnp.full((1, OUT_P), NEG_INF, jnp.float32).at[:, :OUT].set(b3)
    return w1p, b1p, w2p, b2p, w3p, b3p


@functools.partial(jax.jit, static_argnames=("tb",))
def mnist_net_forward(x, padded_params, *, tb=2048):
    """x: (B, 784) float32 (or bfloat16). Returns (B, 10) float32 softmax probs."""
    w1, b1, w2, b2, w3, b3 = padded_params
    B = x.shape[0]

    TB = _pick_batch_tile(B, tb)
    Bp = _round_up(B, TB)
    if Bp != B:
        x = jnp.pad(x, ((0, Bp - B), (0, 0)))   # row padding only; no feature pad/cast

    out = pl.pallas_call(
        mnist_mlp_kernel,
        out_shape=jax.ShapeDtypeStruct((Bp, OUT_P), jnp.float32),
        grid=(Bp // TB,),
        in_specs=[
            pl.BlockSpec((TB, IN_F), lambda i: (i, 0)),      # x: tiled over batch, 784 == full dim
            pl.BlockSpec((IN_F, HID_P), lambda i: (0, 0)),   # weights/biases: VMEM-resident
            pl.BlockSpec((1, HID_P), lambda i: (0, 0)),
            pl.BlockSpec((HID_P, HID_P), lambda i: (0, 0)),
            pl.BlockSpec((1, HID_P), lambda i: (0, 0)),
            pl.BlockSpec((HID_P, OUT_P), lambda i: (0, 0)),
            pl.BlockSpec((1, OUT_P), lambda i: (0, 0)),
        ],
        out_specs=pl.BlockSpec((TB, OUT_P), lambda i: (i, 0)),  # narrow f32 output slab
        compiler_params=pltpu.CompilerParams(
            dimension_semantics=("parallel",),  # batch axis -> both TCs on v7x
        ),
        cost_estimate=pl.CostEstimate(
            flops=2 * Bp * (IN_F * HID_P + HID_P * HID_P + HID_P * OUT_P),
            transcendentals=Bp * OUT_P,
            bytes_accessed=Bp * (IN_F * x.dtype.itemsize + OUT_P * 4),
        ),
    )(x, w1, b1, w2, b2, w3, b3)

    return out[:B, :OUT]


def mnist_net_reference(x, params):
    """Pure-JAX f32 reference (PyTorch semantics)."""
    w1, b1, w2, b2, w3, b3 = params
    h1 = jnp.maximum(x @ w1 + b1, 0.0)
    h2 = jnp.maximum(h1 @ w2 + b2, 0.0)
    logits = h2 @ w3 + b3
    return jax.nn.softmax(logits, axis=-1)


if __name__ == "__main__":
    key = jax.random.PRNGKey(0)
    key, kx = jax.random.split(key)

    B = 8  # small example batch; wrapper row-pads/tiles as needed
    x = jax.random.uniform(kx, (B, IN_F), jnp.float32)  # MNIST-like pixels in [0, 1]

    params = init_params(key)
    padded_params = prepare_params(params)

    out = jax.block_until_ready(mnist_net_forward(x, padded_params))

    # sanity: shape, rows sum to 1 (exact divide), matches f32 reference
    assert out.shape == (B, OUT)
    assert jnp.allclose(jnp.sum(out, axis=1), 1.0, atol=1e-3)
    ref = mnist_net_reference(x, params)
    assert jnp.max(jnp.abs(out - ref)) < 5e-2  # bf16 weights/activations tolerance

    print("KERNEL_OK")
</pallas_src>

<mosaic_0001>
module attributes {stable_mosaic.version = 11 : i64} {
  func.func @mnist_mlp_kernel(%arg0: i32, %arg1: memref<128x784xf32, #tpu.memory_space<vmem>>, %arg2: memref<784x128xbf16, #tpu.memory_space<vmem>>, %arg3: memref<1x128xf32, #tpu.memory_space<vmem>>, %arg4: memref<128x128xbf16, #tpu.memory_space<vmem>>, %arg5: memref<1x128xf32, #tpu.memory_space<vmem>>, %arg6: memref<128x16xbf16, #tpu.memory_space<vmem>>, %arg7: memref<1x16xf32, #tpu.memory_space<vmem>>, %arg8: memref<128x16xf32, #tpu.memory_space<vmem>>) attributes {dimension_semantics = [#tpu.dimension_semantics<parallel>], iteration_bounds = array<i64: 1>, scalar_prefetch = 0 : i64, scratch_operands = 0 : i64, tpu.core_type = #tpu.core_type<tc>, window_params = [{transform_indices = @transform_0, window_bounds = array<i64: 128, 784>}, {pipeline_mode = #tpu.pipeline_mode<synchronous>, transform_indices = @transform_1, window_bounds = array<i64: 784, 128>}, {pipeline_mode = #tpu.pipeline_mode<synchronous>, transform_indices = @transform_2, window_bounds = array<i64: 1, 128>}, {pipeline_mode = #tpu.pipeline_mode<synchronous>, transform_indices = @transform_3, window_bounds = array<i64: 128, 128>}, {pipeline_mode = #tpu.pipeline_mode<synchronous>, transform_indices = @transform_4, window_bounds = array<i64: 1, 128>}, {pipeline_mode = #tpu.pipeline_mode<synchronous>, transform_indices = @transform_5, window_bounds = array<i64: 128, 16>}, {pipeline_mode = #tpu.pipeline_mode<synchronous>, transform_indices = @transform_6, window_bounds = array<i64: 1, 16>}, {transform_indices = @transform_7, window_bounds = array<i64: 128, 16>}]} {
    %c0 = arith.constant 0 : index
    %c0_0 = arith.constant 0 : index
    %0 = vector.load %arg1[%c0, %c0_0] : memref<128x784xf32, #tpu.memory_space<vmem>>, vector<128x784xf32>
    %1 = arith.truncf %0 : vector<128x784xf32> to vector<128x784xbf16>
    %c0_1 = arith.constant 0 : index
    %c0_2 = arith.constant 0 : index
    %2 = vector.load %arg2[%c0_1, %c0_2] : memref<784x128xbf16, #tpu.memory_space<vmem>>, vector<784x128xbf16>
    %cst = arith.constant dense<0.000000e+00> : vector<128x128xf32>
    %3 = tpu.matmul %1, %2, %cst {dimension_numbers = #tpu.dot_dimension_numbers<[1], [0], [0], [1], [0, 0, 1, 1], [], []>} : vector<128x784xbf16>, vector<784x128xbf16>, vector<128x128xf32> -> vector<128x128xf32>
    %c0_3 = arith.constant 0 : index
    %c0_4 = arith.constant 0 : index
    %4 = vector.load %arg3[%c0_3, %c0_4] : memref<1x128xf32, #tpu.memory_space<vmem>>, vector<1x128xf32>
    %5 = vector.broadcast %4 : vector<1x128xf32> to vector<128x128xf32>
    %6 = arith.addf %3, %5 : vector<128x128xf32>
    %cst_5 = arith.constant 0.000000e+00 : f32
    %7 = vector.broadcast %cst_5 : f32 to vector<128x128xf32>
    %8 = arith.maximumf %6, %7 : vector<128x128xf32>
    %9 = arith.truncf %8 : vector<128x128xf32> to vector<128x128xbf16>
    %c0_6 = arith.constant 0 : index
    %c0_7 = arith.constant 0 : index
    %10 = vector.load %arg4[%c0_6, %c0_7] : memref<128x128xbf16, #tpu.memory_space<vmem>>, vector<128x128xbf16>
    %cst_8 = arith.constant dense<0.000000e+00> : vector<128x128xf32>
    %11 = tpu.matmul %9, %10, %cst_8 {dimension_numbers = #tpu.dot_dimension_numbers<[1], [0], [0], [1], [0, 0, 1, 1], [], []>} : vector<128x128xbf16>, vector<128x128xbf16>, vector<128x128xf32> -> vector<128x128xf32>
    %c0_9 = arith.constant 0 : index
    %c0_10 = arith.constant 0 : index
    %12 = vector.load %arg5[%c0_9, %c0_10] : memref<1x128xf32, #tpu.memory_space<vmem>>, vector<1x128xf32>
    %13 = vector.broadcast %12 : vector<1x128xf32> to vector<128x128xf32>
    %14 = arith.addf %11, %13 : vector<128x128xf32>
    %cst_11 = arith.constant 0.000000e+00 : f32
    %15 = vector.broadcast %cst_11 : f32 to vector<128x128xf32>
    %16 = arith.maximumf %14, %15 : vector<128x128xf32>
    %17 = arith.truncf %16 : vector<128x128xf32> to vector<128x128xbf16>
    %c0_12 = arith.constant 0 : index
    %c0_13 = arith.constant 0 : index
    %18 = vector.load %arg6[%c0_12, %c0_13] : memref<128x16xbf16, #tpu.memory_space<vmem>>, vector<128x16xbf16>
    %cst_14 = arith.constant dense<0.000000e+00> : vector<128x16xf32>
    %19 = tpu.matmul %17, %18, %cst_14 {dimension_numbers = #tpu.dot_dimension_numbers<[1], [0], [0], [1], [0, 0, 1, 1], [], []>} : vector<128x128xbf16>, vector<128x16xbf16>, vector<128x16xf32> -> vector<128x16xf32>
    %c0_15 = arith.constant 0 : index
    %c0_16 = arith.constant 0 : index
    %20 = vector.load %arg7[%c0_15, %c0_16] : memref<1x16xf32, #tpu.memory_space<vmem>>, vector<1x16xf32>
    %21 = vector.broadcast %20 : vector<1x16xf32> to vector<128x16xf32>
    %22 = arith.addf %19, %21 : vector<128x16xf32>
    %cst_17 = arith.constant dense<0xFF800000> : vector<128xf32>
    %23 = vector.multi_reduction <maximumf>, %22, %cst_17 [1] : vector<128x16xf32> to vector<128xf32>
    %24 = vector.shape_cast %23 : vector<128xf32> to vector<128x1xf32>
    %25 = vector.broadcast %24 : vector<128x1xf32> to vector<128x16xf32>
    %26 = arith.subf %22, %25 : vector<128x16xf32>
    %27 = math.exp %26 : vector<128x16xf32>
    %cst_18 = arith.constant dense<0.000000e+00> : vector<128xf32>
    %28 = vector.multi_reduction <add>, %27, %cst_18 [1] : vector<128x16xf32> to vector<128xf32>
    %29 = vector.shape_cast %28 : vector<128xf32> to vector<128x1xf32>
    %30 = vector.broadcast %29 : vector<128x1xf32> to vector<128x16xf32>
    %31 = arith.divf %27, %30 : vector<128x16xf32>
    %c0_19 = arith.constant 0 : index
    %c0_20 = arith.constant 0 : index
    %32 = vector.load %arg8[%c0_19, %c0_20] : memref<128x16xf32, #tpu.memory_space<vmem>>, vector<128x16xf32>
    tpu.vector_store %arg8[%c0_19, %c0_20], %31 {strides = array<i32>} : memref<128x16xf32, #tpu.memory_space<vmem>>, vector<128x16xf32>,
    return
  }
  func.func @transform_0(%arg0: i32) -> (i32, i32) {
    %c0_i32 = arith.constant 0 : i32
    %c0_i32_0 = arith.constant 0 : i32
    return %arg0, %c0_i32 : i32, i32
  }
  func.func @transform_1(%arg0: i32) -> (i32, i32) {
    %c0_i32 = arith.constant 0 : i32
    %c0_i32_0 = arith.constant 0 : i32
    %c0_i32_1 = arith.constant 0 : i32
    return %c0_i32, %c0_i32_0 : i32, i32
  }
  func.func @transform_2(%arg0: i32) -> (i32, i32) {
    %c0_i32 = arith.constant 0 : i32
    %c0_i32_0 = arith.constant 0 : i32
    %c0_i32_1 = arith.constant 0 : i32
    return %c0_i32, %c0_i32_0 : i32, i32
  }
  func.func @transform_3(%arg0: i32) -> (i32, i32) {
    %c0_i32 = arith.constant 0 : i32
    %c0_i32_0 = arith.constant 0 : i32
    %c0_i32_1 = arith.constant 0 : i32
    return %c0_i32, %c0_i32_0 : i32, i32
  }
  func.func @transform_4(%arg0: i32) -> (i32, i32) {
    %c0_i32 = arith.constant 0 : i32
    %c0_i32_0 = arith.constant 0 : i32
    %c0_i32_1 = arith.constant 0 : i32
    return %c0_i32, %c0_i32_0 : i32, i32
  }
  func.func @transform_5(%arg0: i32) -> (i32, i32) {
    %c0_i32 = arith.constant 0 : i32
    %c0_i32_0 = arith.constant 0 : i32
    %c0_i32_1 = arith.constant 0 : i32
    return %c0_i32, %c0_i32_0 : i32, i32
  }
  func.func @transform_6(%arg0: i32) -> (i32, i32) {
    %c0_i32 = arith.constant 0 : i32
    %c0_i32_0 = arith.constant 0 : i32
    %c0_i32_1 = arith.constant 0 : i32
    return %c0_i32, %c0_i32_0 : i32, i32
  }
  func.func @transform_7(%arg0: i32) -> (i32, i32) {
    %c0_i32 = arith.constant 0 : i32
    %c0_i32_0 = arith.constant 0 : i32
    return %arg0, %c0_i32 : i32, i32
  }
}

</mosaic_0001>

<bundles_post_ra>
// kernel: mnist_net_forward.1
= control target key start
LH: loop header
LB: loop body
LE: loop exit
PB: predicated region body
PF: predicated region fallthrough
CT: control target
= control target key end

     0   :  { %vm591_vm0 = vcmask 130048   ;;  %s2998_s1 = inlined_call_operand.vmem [shape: bf16[784,128], index: 1, kind: input, shape index: {}]   ;;  %s2999_s2 = inlined_call_operand.vmem [shape: f32[1,128], index: 2, kind: input, shape index: {}]   ;;  %s3000_s0 = inlined_call_operand.vmem [shape: f32[128,784], index: 0, kind: input, shape index: {}]   ;;  %s3001_s3 = inlined_call_operand.vmem [shape: bf16[128,128], index: 3, kind: input, shape index: {}]   ;;  %s3002_s4 = inlined_call_operand.vmem [shape: f32[1,128], index: 4, kind: input, shape index: {}]   ;;  %s3003_s5 = inlined_call_operand.vmem [shape: bf16[128,16], index: 5, kind: input, shape index: {}]   ;;  %s3004_s6 = inlined_call_operand.vmem [shape: f32[1,16], index: 6, kind: input, shape index: {}]   ;;  %s3005_s7 = inlined_call_operand.vmem [shape: f32[128,16], index: 7, kind: output, shape index: {}]  }
   0x1   :  { %v1920_v0 = vld [vmem:[%s2998_s1 + $0x38] sm:$0xff]  ;;  %v1919_v1 = vld [vmem:[%s2998_s1 + $0x30] sm:$0xff]  ;;  %v1918_v2 = vld [vmem:[%s2998_s1 + $0x28] sm:$0xff] }
   0x2   :  { %1978 = vmatpush.bf16.msra.mxu1 %v1920_v0  ;;  %1979 = vmatpush.bf16.msra.mxu2 %v1920_v0  ;;  %v1917_v3 = vld [vmem:[%s2998_s1 + $0x20] sm:$0xff]  ;;  %v1916_v4 = vld [vmem:[%s2998_s1 + $0x18] sm:$0xff]  ;;  %v1915_v5 = vld [vmem:[%s2998_s1 + $0x10] sm:$0xff] }
   0x3   :  { %1980 = vmatpush.bf16.msra.mxu3 %v1920_v0  ;;  %616 = vmatpush.bf16.msra.mxu0 %v1920_v0  ;;  %v1914_v6 = vld [vmem:[%s2998_s1 + $0x8] sm:$0xff]  ;;  %v1913_v7 = vld [vmem:[%s2998_s1] sm:$0xff]  ;;  %v62_v9 = vld [vmem:[%s3000_s0 + $0x118] sm:$0xff] }
   0x4   :  { %v55_v8 = vld [vmem:[%s3000_s0 + $0xe0] sm:$0xff]  ;;  %v90_v11 = vld [vmem:[%s3000_s0 + $0x1f8] sm:$0xff]  ;;  %v1935_v22 = vld [vmem:[%s2998_s1 + $0xb0] sm:$0xff] }
   0x5   :  { %v83_v10 = vld [vmem:[%s3000_s0 + $0x1c0] sm:$0xff]  ;;  %v1936_v12 = vld [vmem:[%s2998_s1 + $0xb8] sm:$0xff]  ;;  %v153_v17 = vpack.c.bf16 %v62_v9, %v55_v8  ;;  %v1927_v24 = vld [vmem:[%s2998_s1 + $0x70] sm:$0xff] }
   0x6   :  { %1981 = vmatpush.bf16.msra.mxu1 %v1919_v1  ;;  %1982 = vmatpush.bf16.msra.mxu2 %v1919_v1  ;;  %v111_v13 = vld [vmem:[%s3000_s0 + $0x2a0] sm:$0xff]  ;;  %v118_v14 = vld [vmem:[%s3000_s0 + $0x2d8] sm:$0xff]  ;;  %v167_v18 = vpack.c.bf16 %v90_v11, %v83_v10  ;;  %v1943_v25 = vld [vmem:[%s2998_s1 + $0xf0] sm:$0xff] }
   0x7   :  { %1983 = vmatpush.bf16.msra.mxu3 %v1919_v1  ;;  %617 = vmatpush.bf16.msra.mxu0 %v1919_v1  ;;  %v1928_v15 = vld [vmem:[%s2998_s1 + $0x78] sm:$0xff]  ;;  %v181_v19 = vpack.c.bf16 %v118_v14, %v111_v13  ;;  %v27_v20 = vld [vmem:[%s3000_s0] sm:$0xff]  ;;  %v1934_v27 = vld [vmem:[%s2998_s1 + $0xa8] sm:$0xff] }
   0x8   :  { %v1944_v16 = vld [vmem:[%s2998_s1 + $0xf8] sm:$0xff]  ;;  %v1951_v28 = vld [vmem:[%s2998_s1 + $0x130] sm:$0xff]  ;;  %v1926_v29 = vld [vmem:[%s2998_s1 + $0x68] sm:$0xff] }
   0x9   :  { %v34_v21 = vld [vmem:[%s3000_s0 + $0x38] sm:$0xff]  ;;  %v1942_v30 = vld [vmem:[%s2998_s1 + $0xe8] sm:$0xff]  ;;  %v1933_v31 = vld [vmem:[%s2998_s1 + $0xa0] sm:$0xff] }
   0xa   :  { %1984 = vmatpush.bf16.msra.mxu1 %v1918_v2  ;;  %1985 = vmatpush.bf16.msra.mxu2 %v1918_v2  ;;  %v1952_v23 = vld [vmem:[%s2998_s1 + $0x138] sm:$0xff]  ;;  %v139_v26 = vpack.c.bf16 %v34_v21, %v27_v20  ;;  %v1950_v32 = vld [vmem:[%s2998_s1 + $0x128] sm:$0xff]  ;;  %v1925_v33 = vld [vmem:[%s2998_s1 + $0x60] sm:$0xff] }
   0xb   :  { %1986 = vmatpush.bf16.msra.mxu3 %v1918_v2  ;;  %618 = vmatpush.bf16.msra.mxu0 %v1918_v2  ;;  %v1941_v34 = vld [vmem:[%s2998_s1 + $0xe0] sm:$0xff]  ;;  %v69_v35 = vld [vmem:[%s3000_s0 + $0x150] sm:$0xff]  ;;  %v76_v36 = vld [vmem:[%s3000_s0 + $0x188] sm:$0xff] }
   0xc   :  { %v97_v37 = vld [vmem:[%s3000_s0 + $0x230] sm:$0xff]  ;;  %v104_v38 = vld [vmem:[%s3000_s0 + $0x268] sm:$0xff]  ;;  %v1932_v39 = vld [vmem:[%s2998_s1 + $0x98] sm:$0xff]  ;;  %v160_v45 = vpack.c.bf16 %v76_v36, %v69_v35 }
   0xd   :  { %v125_v40 = vld [vmem:[%s3000_s0 + $0x310] sm:$0xff]  ;;  %v132_v41 = vld [vmem:[%s3000_s0 + $0x348] sm:$0xff]  ;;  %v1949_v42 = vld [vmem:[%s2998_s1 + $0x120] sm:$0xff]  ;;  %v174_v46 = vpack.c.bf16 %v104_v38, %v97_v37 }
   0xe   :  { %1987 = vmatpush.bf16.msra.mxu1 %v1917_v3  ;;  %1988 = vmatpush.bf16.msra.mxu2 %v1917_v3  ;;  %v1924_v43 = vld [vmem:[%s2998_s1 + $0x58] sm:$0xff]  ;;  %v188_v47 = vpack.c.bf16 %v132_v41, %v125_v40  ;;  %v41_v48 = vld [vmem:[%s3000_s0 + $0x70] sm:$0xff]  ;;  %v48_v49 = vld [vmem:[%s3000_s0 + $0xa8] sm:$0xff] }
   0xf   :  { %1989 = vmatpush.bf16.msra.mxu3 %v1917_v3  ;;  %619 = vmatpush.bf16.msra.mxu0 %v1917_v3  ;;  %v1940_v44 = vld [vmem:[%s2998_s1 + $0xd8] sm:$0xff]  ;;  %v1931_v50 = vld [vmem:[%s2998_s1 + $0x90] sm:$0xff]  ;;  %v146_v54 = vpack.c.bf16 %v48_v49, %v41_v48  ;;  %v1930_v55 = vld [vmem:[%s2998_s1 + $0x88] sm:$0xff] }
  0x10   :  { %v1948_v51 = vld [vmem:[%s2998_s1 + $0x118] sm:$0xff]  ;;  %v1923_v52 = vld [vmem:[%s2998_s1 + $0x50] sm:$0xff]  ;;  %v1922_v57 = vld [vmem:[%s2998_s1 + $0x48] sm:$0xff] }
  0x11   :  { %v1939_v53 = vld [vmem:[%s2998_s1 + $0xd0] sm:$0xff]  ;;  %v1938_v58 = vld [vmem:[%s2998_s1 + $0xc8] sm:$0xff]  ;;  %v1929_v59 = vld [vmem:[%s2998_s1 + $0x80] sm:$0xff] }
  0x12   :  { %1990 = vmatpush.bf16.msra.mxu1 %v1916_v4  ;;  %1991 = vmatpush.bf16.msra.mxu2 %v1916_v4  ;;  %v1947_v56 = vld [vmem:[%s2998_s1 + $0x110] sm:$0xff]  ;;  %v1946_v60 = vld [vmem:[%s2998_s1 + $0x108] sm:$0xff]  ;;  %v1921_v61 = vld [vmem:[%s2998_s1 + $0x40] sm:$0xff] }
  0x13   :  { %1992 = vmatpush.bf16.msra.mxu3 %v1916_v4  ;;  %620 = vmatpush.bf16.msra.mxu0 %v1916_v4  ;;  %v1937_v62 = vld [vmem:[%s2998_s1 + $0xc0] sm:$0xff]  ;;  %v28_v63 = vld [vmem:[%s3000_s0 + $0x8] sm:$0xff]  ;;  %v1960_v1 = vld [vmem:[%s2998_s1 + $0x178] sm:$0xff] }
  0x14   :  { %v1961_v0 = vld [vmem:[%s2998_s1 + $0x180] sm:$0xff]  ;;  %v29_v3 = vld [vmem:[%s3000_s0 + $0x10] sm:$0xff]  ;;  %v36_v4 = vld [vmem:[%s3000_s0 + $0x48] sm:$0xff] }
  0x15   :  { %v35_v2 = vld [vmem:[%s3000_s0 + $0x40] sm:$0xff]  ;;  %v141_v9 = vpack.c.bf16 %v36_v4, %v29_v3  ;;  %v1959_v13 = vld [vmem:[%s2998_s1 + $0x170] sm:$0xff]  ;;  %v44_v20 = vld [vmem:[%s3000_s0 + $0x88] sm:$0xff] }
  0x16   :  { %1993 = vmatpush.bf16.msra.mxu1 %v1915_v5  ;;  %1994 = vmatpush.bf16.msra.mxu2 %v1915_v5  ;;  %v140_v8 = vpack.c.bf16 %v35_v2, %v28_v63  ;;  %v31_v11 = vld [vmem:[%s3000_s0 + $0x20] sm:$0xff]  ;;  %v1956_v41 = vld [vmem:[%s2998_s1 + $0x158] sm:$0xff]  ;;  %v1954_v3 = vld [vmem:[%s2998_s1 + $0x148] sm:$0xff] }
  0x17   :  { %1995 = vmatpush.bf16.msra.mxu3 %v1915_v5  ;;  %621 = vmatpush.bf16.msra.mxu0 %v1915_v5  ;;  %v30_v5 = vld [vmem:[%s3000_s0 + $0x18] sm:$0xff]  ;;  %v51_v21 = vld [vmem:[%s3000_s0 + $0xc0] sm:$0xff] }
  0x18   :  { %v59_v38 = vld [vmem:[%s3000_s0 + $0x100] sm:$0xff]  ;;  %v98_v4 = vld [vmem:[%s3000_s0 + $0x238] sm:$0xff] }
  0x1a   :  { %1996 = vmatpush.bf16.msra.mxu1 %v1914_v6  ;;  %1997 = vmatpush.bf16.msra.mxu2 %v1914_v6 }
  0x1b   :  { %1998 = vmatpush.bf16.msra.mxu3 %v1914_v6  ;;  %622 = vmatpush.bf16.msra.mxu0 %v1914_v6  ;;  %v37_v6 = vld [vmem:[%s3000_s0 + $0x50] sm:$0xff] }
  0x1c   :  { %v142_v10 = vpack.c.bf16 %v37_v6, %v30_v5  ;;  %v105_v5 = vld [vmem:[%s3000_s0 + $0x270] sm:$0xff]  ;;  %v99_v6 = vld [vmem:[%s3000_s0 + $0x240] sm:$0xff] }
  0x1e   :  { %1999 = vmatpush.bf16.msra.mxu1 %v1913_v7  ;;  %2000 = vmatpush.bf16.msra.mxu2 %v1913_v7 }
  0x1f   :  { %2001 = vmatpush.bf16.msra.mxu3 %v1913_v7  ;;  %623 = vmatpush.bf16.msra.mxu0 %v1913_v7  ;;  %v1945_v7 = vld [vmem:[%s2998_s1 + $0x100] sm:$0xff] }
  0x21   :  { %634 = vmatmul.bf16.vlgmr.msra.gmra.mxu1 %v153_v17  ;;  %644 = vmatmul.bf16.vlgmr.msra.gmra.mxu2 %v167_v18  ;;  %v49_v17 = vld [vmem:[%s3000_s0 + $0xb0] sm:$0xff]  ;;  %v43_v18 = vld [vmem:[%s3000_s0 + $0x80] sm:$0xff] }
  0x22   :  { %714 = vmatpush.bf16.msrb.mxu2 %v1936_v12  ;;  %665 = vmatpush.bf16.msrb.mxu1 %v1928_v15  ;;  %v38_v12 = vld [vmem:[%s3000_s0 + $0x58] sm:$0xff]  ;;  %v1958_v15 = vld [vmem:[%s2998_s1 + $0x168] sm:$0xff] }
  0x23   :  { %763 = vmatpush.bf16.msrb.mxu3 %v1944_v16  ;;  %812 = vmatpush.bf16.msrb.mxu0 %v1952_v23  ;;  %v143_v14 = vpack.c.bf16 %v38_v12, %v31_v11  ;;  %v42_v16 = vld [vmem:[%s3000_s0 + $0x78] sm:$0xff] }
  0x24   :  { %654 = vmatmul.bf16.vlgmr.msra.gmra.mxu3 %v181_v19  ;;  %624 = vmatmul.bf16.vlgmr.msra.gmra.mxu0 %v139_v26  ;;  %v50_v19 = vld [vmem:[%s3000_s0 + $0xb8] sm:$0xff]  ;;  %v52_v26 = vld [vmem:[%s3000_s0 + $0xc8] sm:$0xff] }
  0x25   :  { %v148_v23 = vpack.c.bf16 %v50_v19, %v43_v18  ;;  %v119_v18 = vld [vmem:[%s3000_s0 + $0x2e0] sm:$0xff]  ;;  %v113_v19 = vld [vmem:[%s3000_s0 + $0x2b0] sm:$0xff] }
  0x26   :  { %715 = vmatpush.bf16.msrb.mxu2 %v1935_v22  ;;  %666 = vmatpush.bf16.msrb.mxu1 %v1927_v24  ;;  %v147_v22 = vpack.c.bf16 %v49_v17, %v42_v16  ;;  %v149_v24 = vpack.c.bf16 %v51_v21, %v44_v20  ;;  %v1953_v16 = vld [vmem:[%s2998_s1 + $0x140] sm:$0xff]  ;;  %v112_v17 = vld [vmem:[%s3000_s0 + $0x2a8] sm:$0xff]  ;;  %v114_v21 = vld [vmem:[%s3000_s0 + $0x2b8] sm:$0xff] }
  0x27   :  { %764 = vmatpush.bf16.msrb.mxu3 %v1943_v25  ;;  %813 = vmatpush.bf16.msrb.mxu0 %v1951_v28  ;;  %v45_v25 = vld [vmem:[%s3000_s0 + $0x90] sm:$0xff]  ;;  %v1957_v28 = vld [vmem:[%s2998_s1 + $0x160] sm:$0xff]  ;;  %v120_v20 = vld [vmem:[%s3000_s0 + $0x2e8] sm:$0xff] }
  0x2a   :  { %716 = vmatpush.bf16.msrb.mxu2 %v1934_v27  ;;  %667 = vmatpush.bf16.msrb.mxu1 %v1926_v29  ;;  %v150_v27 = vpack.c.bf16 %v52_v26, %v45_v25  ;;  %v56_v29 = vld [vmem:[%s3000_s0 + $0xe8] sm:$0xff] }
  0x2b   :  { %765 = vmatpush.bf16.msrb.mxu3 %v1942_v30  ;;  %814 = vmatpush.bf16.msrb.mxu0 %v1950_v32  ;;  %v63_v30 = vld [vmem:[%s3000_s0 + $0x120] sm:$0xff]  ;;  %v64_v32 = vld [vmem:[%s3000_s0 + $0x128] sm:$0xff] }
  0x2c   :  { %v154_v35 = vpack.c.bf16 %v63_v30, %v56_v29  ;;  %v2477_v30 = vld [vmem:[%s2999_s2] ss:$0 sm:$0xff] }
  0x2e   :  { %717 = vmatpush.bf16.msrb.mxu2 %v1933_v31  ;;  %668 = vmatpush.bf16.msrb.mxu1 %v1925_v33  ;;  %v57_v31 = vld [vmem:[%s3000_s0 + $0xf0] sm:$0xff]  ;;  %v58_v33 = vld [vmem:[%s3000_s0 + $0xf8] sm:$0xff] }
  0x2f   :  { %766 = vmatpush.bf16.msrb.mxu3 %v1941_v34  ;;  %815 = vmatpush.bf16.msrb.mxu0 %v1949_v42  ;;  %v65_v34 = vld [vmem:[%s3000_s0 + $0x130] sm:$0xff]  ;;  %v155_v36 = vpack.c.bf16 %v64_v32, %v57_v31  ;;  %v70_v42 = vld [vmem:[%s3000_s0 + $0x158] sm:$0xff] }
  0x30   :  { %v156_v37 = vpack.c.bf16 %v65_v34, %v58_v33 }
  0x31   :  { %639 = vmatmul.bf16.gmra.mxu1 %v160_v45  ;;  %649 = vmatmul.bf16.gmra.mxu2 %v174_v46  ;;  %v78_v45 = vld [vmem:[%s3000_s0 + $0x198] sm:$0xff]  ;;  %v72_v46 = vld [vmem:[%s3000_s0 + $0x168] sm:$0xff] }
  0x32   :  { %718 = vmatpush.bf16.msrb.mxu2 %v1932_v39  ;;  %669 = vmatpush.bf16.msrb.mxu1 %v1924_v43  ;;  %v66_v39 = vld [vmem:[%s3000_s0 + $0x138] sm:$0xff]  ;;  %v77_v43 = vld [vmem:[%s3000_s0 + $0x190] sm:$0xff] }
  0x33   :  { %767 = vmatpush.bf16.msrb.mxu3 %v1940_v44  ;;  %816 = vmatpush.bf16.msrb.mxu0 %v1948_v51  ;;  %v157_v40 = vpack.c.bf16 %v66_v39, %v59_v38  ;;  %v71_v44 = vld [vmem:[%s3000_s0 + $0x160] sm:$0xff]  ;;  %v161_v48 = vpack.c.bf16 %v77_v43, %v70_v42  ;;  %v73_v51 = vld [vmem:[%s3000_s0 + $0x170] sm:$0xff]  ;;  %v134_v39 = vld [vmem:[%s3000_s0 + $0x358] sm:$0xff] }
  0x34   :  { %659 = vmatmul.bf16.gmra.mxu3 %v188_v47  ;;  %629 = vmatmul.bf16.gmra.mxu0 %v146_v54  ;;  %v79_v47 = vld [vmem:[%s3000_s0 + $0x1a0] sm:$0xff]  ;;  %v162_v49 = vpack.c.bf16 %v78_v45, %v71_v44  ;;  %v1955_v54 = vld [vmem:[%s2998_s1 + $0x150] sm:$0xff] }
  0x35   :  { %v127_v38 = vld [vmem:[%s3000_s0 + $0x320] sm:$0xff] }
  0x36   :  { %719 = vmatpush.bf16.msrb.mxu2 %v1931_v50  ;;  %670 = vmatpush.bf16.msrb.mxu1 %v1923_v52  ;;  %v163_v50 = vpack.c.bf16 %v79_v47, %v72_v46  ;;  %v80_v52 = vld [vmem:[%s3000_s0 + $0x1a8] sm:$0xff]  ;;  %v190_v46 = vpack.c.bf16 %v134_v39, %v127_v38  ;;  %v61_v38 = vld [vmem:[%s3000_s0 + $0x110] sm:$0xff] }
  0x37   :  { %768 = vmatpush.bf16.msrb.mxu3 %v1939_v53  ;;  %817 = vmatpush.bf16.msrb.mxu0 %v1947_v56  ;;  %v164_v53 = vpack.c.bf16 %v80_v52, %v73_v51  ;;  %v91_v56 = vld [vmem:[%s3000_s0 + $0x200] sm:$0xff]  ;;  %v1969_v52 = vld [vmem:[%s3001_s3 + $0x38] sm:$0xff]  ;;  %v68_v39 = vld [vmem:[%s3000_s0 + $0x148] sm:$0xff] }
  0x3a   :  { %720 = vmatpush.bf16.msrb.mxu2 %v1930_v55  ;;  %671 = vmatpush.bf16.msrb.mxu1 %v1922_v57  ;;  %v84_v55 = vld [vmem:[%s3000_s0 + $0x1c8] sm:$0xff]  ;;  %v85_v57 = vld [vmem:[%s3000_s0 + $0x1d0] sm:$0xff] }
  0x3b   :  { %769 = vmatpush.bf16.msrb.mxu3 %v1938_v58  ;;  %818 = vmatpush.bf16.msrb.mxu0 %v1946_v60  ;;  %v92_v58 = vld [vmem:[%s3000_s0 + $0x208] sm:$0xff]  ;;  %v93_v60 = vld [vmem:[%s3000_s0 + $0x210] sm:$0xff] }
  0x3e   :  { %721 = vmatpush.bf16.msrb.mxu2 %v1929_v59  ;;  %672 = vmatpush.bf16.msrb.mxu1 %v1921_v61  ;;  %v86_v59 = vld [vmem:[%s3000_s0 + $0x1d8] sm:$0xff]  ;;  %v168_v61 = vpack.c.bf16 %v91_v56, %v84_v55 }
  0x3f   :  { %770 = vmatpush.bf16.msrb.mxu3 %v1937_v62  ;;  %819 = vmatpush.bf16.msrb.mxu0 %v1945_v7  ;;  %v169_v62 = vpack.c.bf16 %v92_v58, %v85_v57  ;;  %v170_v63 = vpack.c.bf16 %v93_v60, %v86_v59  ;;  %v106_v7 = vld [vmem:[%s3000_s0 + $0x278] sm:$0xff]  ;;  %v32_v59 = vld [vmem:[%s3000_s0 + $0x28] sm:$0xff]  ;;  %v39_v60 = vld [vmem:[%s3000_s0 + $0x60] sm:$0xff] }
  0x40   :  { %v176_v11 = vpack.c.bf16 %v106_v7, %v99_v6  ;;  %v1968_v6 = vld [vmem:[%s3001_s3 + $0x30] sm:$0xff] }
  0x41   :  { %673 = vmatmul.bf16.vlgmr.msrb.gmra.mxu1 %v140_v8  ;;  %722 = vmatmul.bf16.vlgmr.msrb.gmra.mxu2 %v141_v9  ;;  %v100_v8 = vld [vmem:[%s3000_s0 + $0x248] sm:$0xff]  ;;  %v107_v9 = vld [vmem:[%s3000_s0 + $0x280] sm:$0xff] }
  0x42   :  { %917 = vmatpush.bf16.msra.mxu2 %v1961_v0  ;;  %861 = vmatpush.bf16.msra.mxu1 %v1960_v1  ;;  %v87_v0 = vld [vmem:[%s3000_s0 + $0x1e0] sm:$0xff]  ;;  %v94_v1 = vld [vmem:[%s3000_s0 + $0x218] sm:$0xff]  ;;  %v177_v12 = vpack.c.bf16 %v107_v9, %v100_v8 }
  0x43   :  { %v171_v2 = vpack.c.bf16 %v94_v1, %v87_v0  ;;  %1051 = vmatpush.bf16.msra.mxu3 %v1969_v52 }
  0x44   :  { %771 = vmatmul.bf16.vlgmr.msrb.gmra.mxu3 %v142_v10  ;;  %820 = vmatmul.bf16.vlgmr.msrb.gmra.mxu0 %v143_v14  ;;  %v175_v10 = vpack.c.bf16 %v105_v5, %v98_v4  ;;  %v108_v14 = vld [vmem:[%s3000_s0 + $0x288] sm:$0xff] }
  0x46   :  { %862 = vmatpush.bf16.msra.mxu1 %v1959_v13  ;;  %v101_v13 = vld [vmem:[%s3000_s0 + $0x250] sm:$0xff] }
  0x47   :  { %1052 = vmatpush.bf16.msra.mxu3 %v1968_v6  ;;  %v1965_v6 = vld [vmem:[%s3001_s3 + $0x18] sm:$0xff] }
  0x4a   :  { %863 = vmatpush.bf16.msra.mxu1 %v1958_v15  ;;  %v178_v15 = vpack.c.bf16 %v108_v14, %v101_v13  ;;  %v53_v13 = vld [vmem:[%s3000_s0 + $0xd0] sm:$0xff]  ;;  %v47_v14 = vld [vmem:[%s3000_s0 + $0xa0] sm:$0xff] }
  0x4e   :  { %864 = vmatpush.bf16.msra.mxu1 %v1957_v28  ;;  %v122_v28 = vld [vmem:[%s3000_s0 + $0x2f8] sm:$0xff] }
  0x51   :  { %678 = vmatmul.bf16.gmra.mxu1 %v147_v22  ;;  %727 = vmatmul.bf16.gmra.mxu2 %v148_v23  ;;  %v121_v22 = vld [vmem:[%s3000_s0 + $0x2f0] sm:$0xff]  ;;  %v182_v23 = vpack.c.bf16 %v119_v18, %v112_v17 }
  0x52   :  { %865 = vmatpush.bf16.msra.mxu1 %v1956_v41  ;;  %v184_v26 = vpack.c.bf16 %v121_v22, %v114_v21  ;;  %v135_v41 = vld [vmem:[%s3000_s0 + $0x360] sm:$0xff] }
  0x54   :  { %776 = vmatmul.bf16.gmra.mxu3 %v149_v24  ;;  %825 = vmatmul.bf16.gmra.mxu0 %v150_v27  ;;  %v183_v24 = vpack.c.bf16 %v120_v20, %v113_v19  ;;  %v115_v27 = vld [vmem:[%s3000_s0 + $0x2c0] sm:$0xff] }
  0x55   :  { %v185_v29 = vpack.c.bf16 %v122_v28, %v115_v27 }
  0x56   :  { %866 = vmatpush.bf16.msra.mxu1 %v1955_v54 }
  0x5a   :  { %867 = vmatpush.bf16.msra.mxu1 %v1954_v3 }
  0x5e   :  { %868 = vmatpush.bf16.msra.mxu1 %v1953_v16 }
  0x61   :  { %683 = vmatmul.bf16.gmra.mxu1 %v154_v35  ;;  %732 = vmatmul.bf16.gmra.mxu2 %v155_v36  ;;  %v126_v36 = vld [vmem:[%s3000_s0 + $0x318] sm:$0xff] }
  0x64   :  { %781 = vmatmul.bf16.gmra.mxu3 %v156_v37  ;;  %830 = vmatmul.bf16.gmra.mxu0 %v157_v40  ;;  %v133_v37 = vld [vmem:[%s3000_s0 + $0x350] sm:$0xff]  ;;  %v128_v40 = vld [vmem:[%s3000_s0 + $0x328] sm:$0xff] }
  0x65   :  { %v189_v45 = vpack.c.bf16 %v133_v37, %v126_v36  ;;  %v60_v36 = vld [vmem:[%s3000_s0 + $0x108] sm:$0xff]  ;;  %v67_v37 = vld [vmem:[%s3000_s0 + $0x140] sm:$0xff] }
  0x71   :  { %688 = vmatmul.bf16.gmra.mxu1 %v161_v48  ;;  %737 = vmatmul.bf16.gmra.mxu2 %v162_v49  ;;  %v191_v48 = vpack.c.bf16 %v135_v41, %v128_v40  ;;  %v129_v49 = vld [vmem:[%s3000_s0 + $0x330] sm:$0xff] }
  0x74   :  { %786 = vmatmul.bf16.gmra.mxu3 %v163_v50  ;;  %835 = vmatmul.bf16.gmra.mxu0 %v164_v53  ;;  %v136_v50 = vld [vmem:[%s3000_s0 + $0x368] sm:$0xff] }
  0x75   :  { %v192_v51 = vpack.c.bf16 %v136_v50, %v129_v49 }
  0x81   :  { %693 = vmatmul.bf16.gmra.mxu1 %v168_v61  ;;  %742 = vmatmul.bf16.gmra.mxu2 %v169_v62  ;;  %v33_v61 = vld [vmem:[%s3000_s0 + $0x30] sm:$0xff]  ;;  %v40_v62 = vld [vmem:[%s3000_s0 + $0x68] sm:$0xff] }
  0x82   :  { %v145_v3 = vpack.c.bf16 %v40_v62, %v33_v61  ;;  %v75_v61 = vld [vmem:[%s3000_s0 + $0x180] sm:$0xff] }
  0x84   :  { %791 = vmatmul.bf16.gmra.mxu3 %v170_v63  ;;  %840 = vmatmul.bf16.gmra.mxu0 %v171_v2  ;;  %v144_v2 = vpack.c.bf16 %v39_v60, %v32_v59  ;;  %v74_v59 = vld [vmem:[%s3000_s0 + $0x178] sm:$0xff]  ;;  %v81_v60 = vld [vmem:[%s3000_s0 + $0x1b0] sm:$0xff] }
  0x91   :  { %698 = vmatmul.bf16.gmra.mxu1 %v175_v10  ;;  %747 = vmatmul.bf16.gmra.mxu2 %v176_v11 }
  0x94   :  { %796 = vmatmul.bf16.gmra.mxu3 %v177_v12  ;;  %845 = vmatmul.bf16.gmra.mxu0 %v178_v15  ;;  %v46_v12 = vld [vmem:[%s3000_s0 + $0x98] sm:$0xff] }
  0x95   :  { %v54_v15 = vld [vmem:[%s3000_s0 + $0xd8] sm:$0xff]  ;;  %v151_v21 = vpack.c.bf16 %v53_v13, %v46_v12  ;;  %v88_v12 = vld [vmem:[%s3000_s0 + $0x1e8] sm:$0xff]  ;;  %v95_v13 = vld [vmem:[%s3000_s0 + $0x220] sm:$0xff] }
  0x96   :  { %v152_v22 = vpack.c.bf16 %v54_v15, %v47_v14  ;;  %v89_v14 = vld [vmem:[%s3000_s0 + $0x1f0] sm:$0xff] }
  0x9e   :  { %v2466_v25 = vpop.f32.mrf.mxu1 }
  0xa1   :  { %703 = vmatmul.bf16.gmra.mxu1 %v182_v23  ;;  %752 = vmatmul.bf16.gmra.mxu2 %v183_v24  ;;  %v625_v58 = vpop.f32.mrf.mxu0 }
  0xa2   :  { %v626_v0 = vadd.f32 %v2477_v30, %v625_v58 }
  0xa4   :  { %801 = vmatmul.bf16.gmra.mxu3 %v184_v26  ;;  %v645_v31 = vpop.f32.mrf.mxu2  ;;  %850 = vmatmul.bf16.gmra.mxu0 %v185_v29  ;;  %v1967_v26 = vld [vmem:[%s3001_s3 + $0x28] sm:$0xff] }
  0xa5   :  { %v2480_v32 = vadd.f32 %v2477_v30, %v645_v31  ;;  %1053 = vmatpush.bf16.msra.mxu3 %v1967_v26 }
  0xa6   :  { %v2482_v34 = vpop.f32.mrf.mxu1 }
  0xa7   :  { %v655_v33 = vpop.f32.mrf.mxu3 }
  0xa8   :  { %v2485_v35 = vadd.f32 %v2477_v30, %v655_v33 }
  0xa9   :  { %v627_v7 = vpop.f32.mrf.mxu0 }
  0xaa   :  { %v628_v11 = vadd.f32 %v2477_v30, %v627_v7 }
  0xac   :  { %v647_v42 = vpop.f32.mrf.mxu2 }
  0xad   :  { %v2506_v43 = vadd.f32 %v2477_v30, %v647_v42  ;;  %v636_v42 = vadd.f32 %v2477_v30, %v2466_v25 }
  0xae   :  { %v2510_v47 = vpop.f32.mrf.mxu1 }
  0xaf   :  { %v2508_v44 = vpop.f32.mrf.mxu3 }
  0xb1   :  { %708 = vmatmul.bf16.gmra.mxu1 %v189_v45  ;;  %757 = vmatmul.bf16.gmra.mxu2 %v190_v46  ;;  %v630_v17 = vpop.f32.mrf.mxu0  ;;  %v158_v46 = vpack.c.bf16 %v67_v37, %v60_v36 }
  0xb2   :  { %v631_v19 = vadd.f32 %v2477_v30, %v630_v17  ;;  %v172_v17 = vpack.c.bf16 %v95_v13, %v88_v12 }
  0xb4   :  { %806 = vmatmul.bf16.gmra.mxu3 %v191_v48  ;;  %v650_v53 = vpop.f32.mrf.mxu2  ;;  %855 = vmatmul.bf16.gmra.mxu0 %v192_v51  ;;  %v159_v48 = vpack.c.bf16 %v68_v39, %v61_v38  ;;  %v1966_v51 = vld [vmem:[%s3001_s3 + $0x20] sm:$0xff] }
  0xb5   :  { %v2522_v54 = vadd.f32 %v2477_v30, %v650_v53  ;;  %1054 = vmatpush.bf16.msra.mxu3 %v1966_v51  ;;  %v638_v53 = vadd.f32 %v2477_v30, %v2482_v34  ;;  %v82_v34 = vld [vmem:[%s3000_s0 + $0x1b8] sm:$0xff]  ;;  %v116_v51 = vld [vmem:[%s3000_s0 + $0x2c8] sm:$0xff] }
  0xb6   :  { %v2524_v56 = vpop.f32.mrf.mxu1 }
  0xb7   :  { %v660_v55 = vpop.f32.mrf.mxu3 }
  0xb8   :  { %v2527_v57 = vadd.f32 %v2477_v30, %v660_v55 }
  0xb9   :  { %v632_v29 = vpop.f32.mrf.mxu0  ;;  %1055 = vmatpush.bf16.msra.mxu3 %v1965_v6 }
  0xba   :  { %v633_v33 = vadd.f32 %v2477_v30, %v632_v29  ;;  %v102_v29 = vld [vmem:[%s3000_s0 + $0x258] sm:$0xff] }
  0xbc   :  { %v652_v63 = vpop.f32.mrf.mxu2 }
  0xbd   :  { %v2543_v1 = vadd.f32 %v2477_v30, %v652_v63  ;;  %v641_v63 = vadd.f32 %v2477_v30, %v2510_v47 }
  0xbe   :  { %v674_v4 = vpop.f32.mrf.mxu1 }
  0xbf   :  { %v675_v5 = vadd.f32 %v674_v4, %v626_v0 }
  0xc1   :  { %869 = vmatmul.bf16.vlgmr.msra.gmra.mxu1 %v144_v2  ;;  %1841 = vmatmul.msk.bf16.vlgmr.msra.gmra.mxu2 %vm591_vm0, %v145_v3  ;;  %v165_v2 = vpack.c.bf16 %v81_v60, %v74_v59  ;;  %v166_v3 = vpack.c.bf16 %v82_v34, %v75_v61 }
  0xc4   :  { %v723_v8 = vpop.f32.mrf.mxu2 }
  0xc5   :  { %v2549_v9 = vadd.f32 %v723_v8, %v675_v5  ;;  %v643_v8 = vadd.f32 %v2477_v30, %v2524_v56  ;;  %v96_v56 = vld [vmem:[%s3000_s0 + $0x228] sm:$0xff] }
  0xc6   :  { %v676_v10 = vpop.f32.mrf.mxu1 }
  0xc7   :  { %v677_v16 = vadd.f32 %v676_v10, %v628_v11 }
  0xcc   :  { %v725_v18 = vpop.f32.mrf.mxu2 }
  0xcd   :  { %v2565_v20 = vadd.f32 %v725_v18, %v677_v16  ;;  %v173_v18 = vpack.c.bf16 %v96_v56, %v89_v14 }
  0xce   :  { %v679_v23 = vpop.f32.mrf.mxu1 }
  0xcf   :  { %v680_v24 = vadd.f32 %v679_v23, %v631_v19 }
  0xd1   :  { %874 = vmatmul.bf16.gmra.mxu1 %v151_v21  ;;  %1842 = vmatmul.msk.bf16.gmra.mxu2 %vm591_vm0, %v152_v22  ;;  %v1964_v22 = vld [vmem:[%s3001_s3 + $0x10] sm:$0xff] }
  0xd2   :  { %1056 = vmatpush.bf16.msra.mxu3 %v1964_v22 }
  0xd4   :  { %v728_v27 = vpop.f32.mrf.mxu2 }
  0xd5   :  { %v2571_v28 = vadd.f32 %v728_v27, %v680_v24 }
  0xd6   :  { %v681_v31 = vpop.f32.mrf.mxu1 }
  0xd7   :  { %v682_v40 = vadd.f32 %v681_v31, %v633_v33  ;;  %v103_v31 = vld [vmem:[%s3000_s0 + $0x260] sm:$0xff]  ;;  %v110_v33 = vld [vmem:[%s3000_s0 + $0x298] sm:$0xff] }
  0xd8   :  { %v180_v38 = vpack.c.bf16 %v110_v33, %v103_v31 }
  0xdc   :  { %v730_v41 = vpop.f32.mrf.mxu2 }
  0xdd   :  { %v2588_v45 = vadd.f32 %v730_v41, %v682_v40  ;;  %v1963_v41 = vld [vmem:[%s3001_s3 + $0x8] sm:$0xff] }
  0xde   :  { %v684_v49 = vpop.f32.mrf.mxu1  ;;  %1057 = vmatpush.bf16.msra.mxu3 %v1963_v41 }
  0xdf   :  { %v685_v50 = vadd.f32 %v684_v49, %v636_v42  ;;  %v662_v42 = vpop.f32.mrf.mxu3 }
  0xe0   :  { %v663_v22 = vadd.f32 %v2477_v30, %v662_v42 }
  0xe1   :  { %879 = vmatmul.bf16.gmra.mxu1 %v158_v46  ;;  %1843 = vmatmul.msk.bf16.gmra.mxu2 %vm591_vm0, %v159_v48 }
  0xe4   :  { %v733_v52 = vpop.f32.mrf.mxu2 }
  0xe5   :  { %v2596_v55 = vadd.f32 %v733_v52, %v685_v50  ;;  %v117_v52 = vld [vmem:[%s3000_s0 + $0x2d0] sm:$0xff] }
  0xe6   :  { %v686_v25 = vpop.f32.mrf.mxu1 }
  0xe7   :  { %v687_v58 = vadd.f32 %v686_v25, %v638_v53  ;;  %v124_v53 = vld [vmem:[%s3000_s0 + $0x308] sm:$0xff]  ;;  %v772_v25 = vpop.f32.mrf.mxu3 }
  0xe8   :  { %v187_v60 = vpack.c.bf16 %v124_v53, %v117_v52 }
  0xec   :  { %v735_v62 = vpop.f32.mrf.mxu2 }
  0xed   :  { %v2612_v0 = vadd.f32 %v735_v62, %v687_v58  ;;  %v821_v62 = vpop.f32.mrf.mxu0 }
  0xee   :  { %v689_v4 = vpop.f32.mrf.mxu1 }
  0xef   :  { %v690_v5 = vadd.f32 %v689_v4, %v641_v63  ;;  %v1962_v63 = vld [vmem:[%s3001_s3] sm:$0xff] }
  0xf0   :  { %1058 = vmatpush.bf16.msra.mxu3 %v1962_v63 }
  0xf1   :  { %884 = vmatmul.bf16.gmra.mxu1 %v165_v2  ;;  %1844 = vmatmul.msk.bf16.gmra.mxu2 %vm591_vm0, %v166_v3  ;;  %v658_v3 = vadd.f32 %v2477_v30, %v2508_v44  ;;  %v138_v44 = vld [vmem:[%s3000_s0 + $0x378] sm:$0xff] }
  0xf2   :  { %v1977_v30 = vld [vmem:[%s3003_s5 + $0x38] sm:$0xff] }
  0xf3   :  { %1192 = vmatpush.bf16.msra.mxu0 %v1977_v30 }
  0xf4   :  { %v738_v7 = vpop.f32.mrf.mxu2 }
  0xf5   :  { %v2620_v10 = vadd.f32 %v738_v7, %v690_v5  ;;  %v774_v5 = vpop.f32.mrf.mxu3 }
  0xf6   :  { %v691_v47 = vpop.f32.mrf.mxu1 }
  0xf7   :  { %v692_v11 = vadd.f32 %v691_v47, %v643_v8  ;;  %v823_v8 = vpop.f32.mrf.mxu0  ;;  %v137_v47 = vld [vmem:[%s3000_s0 + $0x370] sm:$0xff] }
  0xfc   :  { %v740_v15 = vpop.f32.mrf.mxu2 }
  0xfd   :  { %v2634_v16 = vadd.f32 %v740_v15, %v692_v11  ;;  %v131_v11 = vld [vmem:[%s3000_s0 + $0x340] sm:$0xff] }
  0xfe   :  { %v694_v19 = vpop.f32.mrf.mxu1  ;;  %v194_v56 = vpack.c.bf16 %v138_v44, %v131_v11 }
  0xff   :  { %v695_v21 = vadd.f32 %v694_v19, %v2480_v32  ;;  %v109_v32 = vld [vmem:[%s3000_s0 + $0x290] sm:$0xff]  ;;  %v826_v19 = vpop.f32.mrf.mxu0 }
 0x101   :  { %889 = vmatmul.bf16.gmra.mxu1 %v172_v17  ;;  %1845 = vmatmul.msk.bf16.gmra.mxu2 %vm591_vm0, %v173_v18  ;;  %v777_v18 = vpop.f32.mrf.mxu3 }
 0x104   :  { %v743_v23 = vpop.f32.mrf.mxu2 }
 0x105   :  { %v2641_v24 = vadd.f32 %v743_v23, %v695_v21 }
 0x106   :  { %v696_v26 = vpop.f32.mrf.mxu1 }
 0x107   :  { %v697_v27 = vadd.f32 %v696_v26, %v2506_v43  ;;  %v179_v43 = vpack.c.bf16 %v109_v32, %v102_v29  ;;  %v828_v33 = vpop.f32.mrf.mxu0 }
 0x109   :  { %v779_v29 = vpop.f32.mrf.mxu3 }
 0x10c   :  { %v745_v36 = vpop.f32.mrf.mxu2 }
 0x10d   :  { %v2656_v37 = vadd.f32 %v745_v36, %v697_v27 }
 0x10e   :  { %v699_v39 = vpop.f32.mrf.mxu1 }
 0x10f   :  { %v700_v40 = vadd.f32 %v699_v39, %v2522_v54  ;;  %v123_v54 = vld [vmem:[%s3000_s0 + $0x300] sm:$0xff]  ;;  %v775_v39 = vadd.f32 %v774_v5, %v2565_v20  ;;  %v831_v42 = vpop.f32.mrf.mxu0 }
 0x111   :  { %894 = vmatmul.bf16.gmra.mxu1 %v179_v43  ;;  %1846 = vmatmul.msk.bf16.gmra.mxu2 %vm591_vm0, %v180_v38  ;;  %v782_v43 = vpop.f32.mrf.mxu3 }
 0x114   :  { %v748_v46 = vpop.f32.mrf.mxu2 }
 0x115   :  { %v2663_v48 = vadd.f32 %v748_v46, %v700_v40  ;;  %v824_v46 = vadd.f32 %v823_v8, %v775_v39 }
 0x116   :  { %v701_v49 = vpop.f32.mrf.mxu1 }
 0x117   :  { %v702_v50 = vadd.f32 %v701_v49, %v2543_v1  ;;  %v186_v1 = vpack.c.bf16 %v123_v54, %v116_v51  ;;  %v833_v20 = vpop.f32.mrf.mxu0 }
 0x119   :  { %v784_v53 = vpop.f32.mrf.mxu3 }
 0x11c   :  { %v750_v58 = vpop.f32.mrf.mxu2 }
 0x11d   :  { %v2678_v59 = vadd.f32 %v750_v58, %v702_v50 }
 0x11e   :  { %v704_v61 = vpop.f32.mrf.mxu1 }
 0x11f   :  { %v705_v34 = vadd.f32 %v704_v61, %v2485_v35  ;;  %v130_v35 = vld [vmem:[%s3000_s0 + $0x338] sm:$0xff]  ;;  %v836_v8 = vpop.f32.mrf.mxu0 }
 0x120   :  { %v193_v14 = vpack.c.bf16 %v137_v47, %v130_v35 }
 0x121   :  { %899 = vmatmul.bf16.gmra.mxu1 %v186_v1  ;;  %1847 = vmatmul.msk.bf16.gmra.mxu2 %vm591_vm0, %v187_v60  ;;  %v778_v60 = vadd.f32 %v777_v18, %v2571_v28 }
 0x123   :  { %v827_v63 = vadd.f32 %v826_v19, %v778_v60 }
 0x124   :  { %v753_v2 = vpop.f32.mrf.mxu2 }
 0x125   :  { %v2687_v4 = vadd.f32 %v753_v2, %v705_v34  ;;  %v780_v34 = vadd.f32 %v779_v29, %v2588_v45  ;;  %v1976_v2 = vld [vmem:[%s3003_s5 + $0x30] sm:$0xff] }
 0x126   :  { %v706_v6 = vpop.f32.mrf.mxu1  ;;  %1193 = vmatpush.bf16.msra.mxu0 %v1976_v2 }
 0x127   :  { %v707_v7 = vadd.f32 %v706_v6, %v658_v3  ;;  %v787_v3 = vpop.f32.mrf.mxu3  ;;  %v829_v5 = vadd.f32 %v828_v33, %v780_v34  ;;  %v838_v18 = vpop.f32.mrf.mxu0 }
 0x12c   :  { %v755_v12 = vpop.f32.mrf.mxu2 }
 0x12d   :  { %v2701_v13 = vadd.f32 %v755_v12, %v707_v7 }
 0x12e   :  { %v709_v15 = vpop.f32.mrf.mxu1 }
 0x12f   :  { %v710_v17 = vadd.f32 %v709_v15, %v2527_v57  ;;  %v773_v57 = vadd.f32 %v772_v25, %v2549_v9  ;;  %v789_v45 = vpop.f32.mrf.mxu3  ;;  %v841_v39 = vpop.f32.mrf.mxu0 }
 0x130   :  { %v790_v30 = vadd.f32 %v789_v45, %v2634_v16 }
 0x131   :  { %904 = vmatmul.bf16.gmra.mxu1 %v193_v14  ;;  %1848 = vmatmul.msk.bf16.gmra.mxu2 %vm591_vm0, %v194_v56  ;;  %v822_v41 = vadd.f32 %v821_v62, %v773_v57  ;;  %v783_v56 = vadd.f32 %v782_v43, %v2596_v55 }
 0x134   :  { %v758_v21 = vpop.f32.mrf.mxu2 }
 0x135   :  { %v2706_v23 = vadd.f32 %v758_v21, %v710_v17  ;;  %v785_v17 = vadd.f32 %v784_v53, %v2612_v0  ;;  %v832_v21 = vadd.f32 %v831_v42, %v783_v56 }
 0x136   :  { %v711_v26 = vpop.f32.mrf.mxu1 }
 0x137   :  { %v712_v27 = vadd.f32 %v711_v26, %v663_v22  ;;  %v1975_v22 = vld [vmem:[%s3003_s5 + $0x28] sm:$0xff]  ;;  %v834_v26 = vadd.f32 %v833_v20, %v785_v17  ;;  %v792_v33 = vpop.f32.mrf.mxu3 }
 0x138   :  { %1194 = vmatpush.bf16.msra.mxu0 %v1975_v22 }
 0x13c   :  { %v760_v32 = vpop.f32.mrf.mxu2 }
 0x13d   :  { %v2708_v31 = vadd.f32 %v760_v32, %v712_v27 }
 0x13e   :  { %v870_v36 = vpop.f32.mrf.mxu1 }
 0x13f   :  { %v871_v49 = vadd.f32 %v870_v36, %v822_v41  ;;  %v794_v42 = vpop.f32.mrf.mxu3 }
 0x144   :  { %v919_v38 = vpop.f32.mrf.mxu2 }
 0x145   :  { %v920_v50 = vadd.f32 %v919_v38, %v871_v49 }
 0x146   :  { %v872_v40 = vpop.f32.mrf.mxu1 }
 0x147   :  { %v873_v51 = vadd.f32 %v872_v40, %v824_v46  ;;  %v959_v25 = vmax.f32 %v920_v50, 0.0  ;;  %v788_v40 = vadd.f32 %v787_v3, %v2620_v10  ;;  %v1974_v50 = vld [vmem:[%s3003_s5 + $0x20] sm:$0xff]  ;;  %v797_v60 = vpop.f32.mrf.mxu3 }
 0x148   :  { %1195 = vmatpush.bf16.msra.mxu0 %v1974_v50 }
 0x149   :  { %v837_v49 = vadd.f32 %v836_v8, %v788_v40 }
 0x14c   :  { %v921_v54 = vpop.f32.mrf.mxu2 }
 0x14d   :  { %v922_v52 = vadd.f32 %v921_v54, %v873_v51  ;;  %v839_v51 = vadd.f32 %v838_v18, %v790_v30  ;;  %v1970_v30 = vld [vmem:[%s3003_s5] sm:$0xff] }
 0x14e   :  { %v875_v9 = vpop.f32.mrf.mxu1 }
 0x14f   :  { %v960_v58 = vmax.f32 %v922_v52, 0.0  ;;  %v876_v6 = vadd.f32 %v875_v9, %v827_v63  ;;  %v843_v52 = vpop.f32.mrf.mxu0  ;;  %v795_v63 = vadd.f32 %v794_v42, %v2656_v37  ;;  %v798_v37 = vadd.f32 %v797_v60, %v2663_v48 }
 0x151   :  { %v975_v1 = vpack.c.bf16 %v960_v58, %v959_v25 }
 0x153   :  { %1059 = vmatmul.bf16.vlgmr.msra.gmra.mxu3 %v975_v1 }
 0x154   :  { %v924_v61 = vpop.f32.mrf.mxu2 }
 0x155   :  { %v925_v7 = vadd.f32 %v924_v61, %v876_v6  ;;  %v793_v61 = vadd.f32 %v792_v33, %v2641_v24  ;;  %v844_v6 = vadd.f32 %v843_v52, %v795_v63 }
 0x156   :  { %v877_v62 = vpop.f32.mrf.mxu1 }
 0x157   :  { %v878_v35 = vadd.f32 %v877_v62, %v829_v5  ;;  %v961_v44 = vmax.f32 %v925_v7, 0.0  ;;  %v846_v34 = vpop.f32.mrf.mxu0  ;;  %v842_v3 = vadd.f32 %v841_v39, %v793_v61  ;;  %v1973_v5 = vld [vmem:[%s3003_s5 + $0x18] sm:$0xff] }
 0x158   :  { %1196 = vmatpush.bf16.msra.mxu0 %v1973_v5 }
 0x15c   :  { %v926_v47 = vpop.f32.mrf.mxu2 }
 0x15d   :  { %v927_v11 = vadd.f32 %v926_v47, %v878_v35  ;;  %v799_v35 = vpop.f32.mrf.mxu3 }
 0x15e   :  { %v880_v28 = vpop.f32.mrf.mxu1  ;;  %v800_v17 = vadd.f32 %v799_v35, %v2678_v59 }
 0x15f   :  { %v962_v12 = vmax.f32 %v927_v11, 0.0  ;;  %v881_v27 = vadd.f32 %v880_v28, %v832_v21  ;;  %v848_v24 = vpop.f32.mrf.mxu0  ;;  %v1972_v21 = vld [vmem:[%s3003_s5 + $0x10] sm:$0xff] }
 0x160   :  { %1197 = vmatpush.bf16.msra.mxu0 %v1972_v21 }
 0x161   :  { %v976_v14 = vpack.c.bf16 %v962_v12, %v961_v44 }
 0x163   :  { %1064 = vmatmul.bf16.gmra.mxu3 %v976_v14 }
 0x164   :  { %v929_v15 = vpop.f32.mrf.mxu2 }
 0x165   :  { %v930_v29 = vadd.f32 %v929_v15, %v881_v27  ;;  %v802_v56 = vpop.f32.mrf.mxu3 }
 0x166   :  { %v882_v19 = vpop.f32.mrf.mxu1  ;;  %v803_v39 = vadd.f32 %v802_v56, %v2687_v4 }
 0x167   :  { %v883_v32 = vadd.f32 %v882_v19, %v834_v26  ;;  %v963_v43 = vmax.f32 %v930_v29, 0.0  ;;  %v847_v19 = vadd.f32 %v846_v34, %v798_v37  ;;  %v851_v22 = vpop.f32.mrf.mxu0  ;;  %v849_v26 = vadd.f32 %v848_v24, %v800_v17 }
 0x16c   :  { %v931_v36 = vpop.f32.mrf.mxu2 }
 0x16d   :  { %v932_v57 = vadd.f32 %v931_v36, %v883_v32  ;;  %v804_v48 = vpop.f32.mrf.mxu3 }
 0x16e   :  { %v885_v55 = vpop.f32.mrf.mxu1 }
 0x16f   :  { %v964_v38 = vmax.f32 %v932_v57, 0.0  ;;  %v886_v54 = vadd.f32 %v885_v55, %v837_v49  ;;  %v853_v59 = vpop.f32.mrf.mxu0 }
 0x171   :  { %v977_v0 = vpack.c.bf16 %v964_v38, %v963_v43 }
 0x173   :  { %1069 = vmatmul.bf16.gmra.mxu3 %v977_v0  ;;  %v1971_v0 = vld [vmem:[%s3003_s5 + $0x8] sm:$0xff] }
 0x174   :  { %v934_v41 = vpop.f32.mrf.mxu2  ;;  %1198 = vmatpush.bf16.msra.mxu0 %v1971_v0 }
 0x175   :  { %v935_v53 = vadd.f32 %v934_v41, %v886_v54  ;;  %v805_v41 = vadd.f32 %v804_v48, %v2701_v13  ;;  %v807_v49 = vpop.f32.mrf.mxu3 }
 0x176   :  { %v887_v46 = vpop.f32.mrf.mxu1 }
 0x177   :  { %v888_v9 = vadd.f32 %v887_v46, %v839_v51  ;;  %v965_v1 = vmax.f32 %v935_v53, 0.0  ;;  %v852_v46 = vadd.f32 %v851_v22, %v803_v39  ;;  %v854_v50 = vadd.f32 %v853_v59, %v805_v41  ;;  %v856_v52 = vpop.f32.mrf.mxu0 }
 0x178   :  { %1199 = vmatpush.bf16.msra.mxu0 %v1970_v30 }
 0x17c   :  { %v936_v25 = vpop.f32.mrf.mxu2 }
 0x17d   :  { %v937_v58 = vadd.f32 %v936_v25, %v888_v9 }
 0x17e   :  { %v890_v10 = vpop.f32.mrf.mxu1 }
 0x17f   :  { %v966_v20 = vmax.f32 %v937_v58, 0.0  ;;  %v891_v7 = vadd.f32 %v890_v10, %v842_v3  ;;  %v858_v61 = vpop.f32.mrf.mxu0 }
 0x181   :  { %v978_v16 = vpack.c.bf16 %v966_v20, %v965_v1  ;;  %v809_v1 = vpop.f32.mrf.mxu3  ;;  %v808_v20 = vadd.f32 %v807_v49, %v2706_v23  ;;  %v2003_v23 = vld [vmem:[%s3002_s4] ss:$0 sm:$0xff] }
 0x183   :  { %1074 = vmatmul.bf16.gmra.mxu3 %v978_v16  ;;  %v810_v16 = vadd.f32 %v809_v1, %v2708_v31  ;;  %v857_v34 = vadd.f32 %v856_v52, %v808_v20 }
 0x184   :  { %v939_v62 = vpop.f32.mrf.mxu2 }
 0x185   :  { %v940_v8 = vadd.f32 %v939_v62, %v891_v7  ;;  %v859_v63 = vadd.f32 %v858_v61, %v810_v16 }
 0x186   :  { %v892_v2 = vpop.f32.mrf.mxu1 }
 0x187   :  { %v893_v47 = vadd.f32 %v892_v2, %v844_v6  ;;  %v967_v12 = vmax.f32 %v940_v8, 0.0 }
 0x18c   :  { %v941_v11 = vpop.f32.mrf.mxu2 }
 0x18d   :  { %v942_v28 = vadd.f32 %v941_v11, %v893_v47 }
 0x18e   :  { %v895_v44 = vpop.f32.mrf.mxu1 }
 0x18f   :  { %v968_v14 = vmax.f32 %v942_v28, 0.0  ;;  %v896_v27 = vadd.f32 %v895_v44, %v847_v19 }
 0x191   :  { %v979_v45 = vpack.c.bf16 %v968_v14, %v967_v12 }
 0x193   :  { %1079 = vmatmul.bf16.gmra.mxu3 %v979_v45 }
 0x194   :  { %v944_v15 = vpop.f32.mrf.mxu2 }
 0x195   :  { %v945_v29 = vadd.f32 %v944_v15, %v896_v27 }
 0x196   :  { %v897_v18 = vpop.f32.mrf.mxu1 }
 0x197   :  { %v898_v32 = vadd.f32 %v897_v18, %v849_v26  ;;  %v969_v55 = vmax.f32 %v945_v29, 0.0 }
 0x19c   :  { %v946_v33 = vpop.f32.mrf.mxu2 }
 0x19d   :  { %v947_v36 = vadd.f32 %v946_v33, %v898_v32 }
 0x19e   :  { %v900_v57 = vpop.f32.mrf.mxu1 }
 0x19f   :  { %v970_v43 = vmax.f32 %v947_v36, 0.0  ;;  %v901_v51 = vadd.f32 %v900_v57, %v852_v46 }
 0x1a1   :  { %v980_v38 = vpack.c.bf16 %v970_v43, %v969_v55 }
 0x1a3   :  { %1084 = vmatmul.bf16.gmra.mxu3 %v980_v38 }
 0x1a4   :  { %v949_v40 = vpop.f32.mrf.mxu2 }
 0x1a5   :  { %v950_v4 = vadd.f32 %v949_v40, %v901_v51 }
 0x1a6   :  { %v902_v42 = vpop.f32.mrf.mxu1 }
 0x1a7   :  { %v903_v54 = vadd.f32 %v902_v42, %v854_v50  ;;  %v971_v58 = vmax.f32 %v950_v4, 0.0 }
 0x1ac   :  { %v951_v53 = vpop.f32.mrf.mxu2 }
 0x1ad   :  { %v952_v9 = vadd.f32 %v951_v53, %v903_v54 }
 0x1ae   :  { %v905_v25 = vpop.f32.mrf.mxu1 }
 0x1af   :  { %v972_v10 = vmax.f32 %v952_v9, 0.0  ;;  %v906_v2 = vadd.f32 %v905_v25, %v857_v34 }
 0x1b1   :  { %v981_v13 = vpack.c.bf16 %v972_v10, %v971_v58 }
 0x1b3   :  { %1089 = vmatmul.bf16.gmra.mxu3 %v981_v13 }
 0x1b4   :  { %v954_v60 = vpop.f32.mrf.mxu2 }
 0x1b5   :  { %v955_v3 = vadd.f32 %v954_v60, %v906_v2 }
 0x1b6   :  { %v907_v62 = vpop.f32.mrf.mxu1 }
 0x1b7   :  { %v908_v5 = vadd.f32 %v907_v62, %v859_v63  ;;  %v973_v35 = vmax.f32 %v955_v3, 0.0  ;;  %v2756_v3 = vld [vmem:[%s3004_s6] ss:$0 sm:$0xff] }
 0x1bc   :  { %v956_v6 = vpop.f32.mrf.mxu2 }
 0x1bd   :  { %v957_v7 = vadd.f32 %v956_v6, %v908_v5 }
 0x1bf   :  { %v974_v8 = vmax.f32 %v957_v7, 0.0 }
 0x1c1   :  { %v982_v47 = vpack.c.bf16 %v974_v8, %v973_v35 }
 0x1c3   :  { %1094 = vmatmul.bf16.gmra.mxu3 %v982_v47 }
 0x1d6   :  { %v1060_v11 = vpop.f32.mrf.mxu3 }
 0x1d7   :  { %v1061_v28 = vadd.f32 %v2003_v23, %v1060_v11 }
 0x1d9   :  { %v1100_v44 = vmax.f32 %v1061_v28, 0.0 }
 0x1de   :  { %v1062_v31 = vpop.f32.mrf.mxu3 }
 0x1df   :  { %v1063_v24 = vadd.f32 %v2003_v23, %v1062_v31 }
 0x1e1   :  { %v1101_v12 = vmax.f32 %v1063_v24, 0.0 }
 0x1e3   :  { %v1116_v14 = vpack.c.bf16 %v1101_v12, %v1100_v44 }
 0x1e5   :  { %1200 = vmatmul.bf16.vlgmr.msra.gmra.mxu0 %v1116_v14 }
 0x1e6   :  { %v1065_v45 = vpop.f32.mrf.mxu3 }
 0x1e7   :  { %v1066_v37 = vadd.f32 %v2003_v23, %v1065_v45 }
 0x1e9   :  { %v1102_v17 = vmax.f32 %v1066_v37, 0.0 }
 0x1ee   :  { %v1067_v56 = vpop.f32.mrf.mxu3 }
 0x1ef   :  { %v1068_v15 = vadd.f32 %v2003_v23, %v1067_v56 }
 0x1f1   :  { %v1103_v18 = vmax.f32 %v1068_v15, 0.0 }
 0x1f3   :  { %v1117_v19 = vpack.c.bf16 %v1103_v18, %v1102_v17 }
 0x1f5   :  { %1205 = vmatmul.bf16.gmra.mxu0 %v1117_v19 }
 0x1f6   :  { %v1070_v21 = vpop.f32.mrf.mxu3 }
 0x1f7   :  { %v1071_v22 = vadd.f32 %v2003_v23, %v1070_v21 }
 0x1f9   :  { %v1104_v29 = vmax.f32 %v1071_v22, 0.0 }
 0x1fe   :  { %v1072_v26 = vpop.f32.mrf.mxu3 }
 0x1ff   :  { %v1073_v27 = vadd.f32 %v2003_v23, %v1072_v26 }
 0x201   :  { %v1105_v32 = vmax.f32 %v1073_v27, 0.0 }
 0x203   :  { %v1118_v33 = vpack.c.bf16 %v1105_v32, %v1104_v29 }
 0x205   :  { %1210 = vmatmul.bf16.gmra.mxu0 %v1118_v33 }
 0x206   :  { %v1075_v36 = vpop.f32.mrf.mxu3 }
 0x207   :  { %v1076_v48 = vadd.f32 %v2003_v23, %v1075_v36 }
 0x209   :  { %v1106_v43 = vmax.f32 %v1076_v48, 0.0 }
 0x20e   :  { %v1077_v57 = vpop.f32.mrf.mxu3 }
 0x20f   :  { %v1078_v55 = vadd.f32 %v2003_v23, %v1077_v57 }
 0x211   :  { %v1107_v38 = vmax.f32 %v1078_v55, 0.0 }
 0x213   :  { %v1119_v59 = vpack.c.bf16 %v1107_v38, %v1106_v43 }
 0x215   :  { %1215 = vmatmul.bf16.gmra.mxu0 %v1119_v59 }
 0x216   :  { %v1080_v39 = vpop.f32.mrf.mxu3 }
 0x217   :  { %v1081_v0 = vadd.f32 %v2003_v23, %v1080_v39 }
 0x219   :  { %v1108_v30 = vmax.f32 %v1081_v0, 0.0 }
 0x21e   :  { %v1082_v40 = vpop.f32.mrf.mxu3 }
 0x21f   :  { %v1083_v41 = vadd.f32 %v2003_v23, %v1082_v40 }
 0x221   :  { %v1109_v42 = vmax.f32 %v1083_v41, 0.0 }
 0x223   :  { %v1120_v46 = vpack.c.bf16 %v1109_v42, %v1108_v30 }
 0x225   :  { %1220 = vmatmul.bf16.gmra.mxu0 %v1120_v46 }
 0x226   :  { %v1085_v49 = vpop.f32.mrf.mxu3 }
 0x227   :  { %v1086_v50 = vadd.f32 %v2003_v23, %v1085_v49 }
 0x229   :  { %v1110_v54 = vmax.f32 %v1086_v50, 0.0 }
 0x22e   :  { %v1087_v51 = vpop.f32.mrf.mxu3 }
 0x22f   :  { %v1088_v4 = vadd.f32 %v2003_v23, %v1087_v51 }
 0x231   :  { %v1111_v52 = vmax.f32 %v1088_v4, 0.0 }
 0x233   :  { %v1121_v53 = vpack.c.bf16 %v1111_v52, %v1110_v54 }
 0x235   :  { %1225 = vmatmul.bf16.gmra.mxu0 %v1121_v53 }
 0x236   :  { %v1090_v9 = vpop.f32.mrf.mxu3 }
 0x237   :  { %v1091_v25 = vadd.f32 %v2003_v23, %v1090_v9 }
 0x239   :  { %v1112_v13 = vmax.f32 %v1091_v25, 0.0 }
 0x23e   :  { %v1092_v58 = vpop.f32.mrf.mxu3 }
 0x23f   :  { %v1093_v10 = vadd.f32 %v2003_v23, %v1092_v58 }
 0x241   :  { %v1113_v1 = vmax.f32 %v1093_v10, 0.0 }
 0x243   :  { %v1122_v20 = vpack.c.bf16 %v1113_v1, %v1112_v13 }
 0x245   :  { %1230 = vmatmul.bf16.gmra.mxu0 %v1122_v20 }
 0x246   :  { %v1095_v60 = vpop.f32.mrf.mxu3 }
 0x247   :  { %v1096_v16 = vadd.f32 %v2003_v23, %v1095_v60 }
 0x249   :  { %v1114_v62 = vmax.f32 %v1096_v16, 0.0 }
 0x24e   :  { %v1097_v61 = vpop.f32.mrf.mxu3 }
 0x24f   :  { %v1098_v34 = vadd.f32 %v2003_v23, %v1097_v61 }
 0x251   :  { %v1115_v63 = vmax.f32 %v1098_v34, 0.0 }
 0x253   :  { %v1123_v2 = vpack.c.bf16 %v1115_v63, %v1114_v62 }
 0x255   :  { %1235 = vmatmul.bf16.gmra.mxu0 %v1123_v2 }
 0x262   :  { %v1201_v5 = vpop.f32.mrf.mxu0 }
 0x263   :  { %v2759_v6 = vadd.f32 %v2756_v3, %v1201_v5 }
 0x265   :  { %v1241_v7 = vsel %vm591_vm0, %v2759_v6, -inf }
 0x266   :  { %1242 = vmax.xlane.f32.xlu0 %v1241_v7 }
 0x26a   :  { %v1203_v35 = vpop.f32.mrf.mxu0 }
 0x26b   :  { %v2764_v8 = vadd.f32 %v2756_v3, %v1203_v35 }
 0x26d   :  { %v1244_v47 = vsel %vm591_vm0, %v2764_v8, -inf }
 0x26e   :  { %1245 = vmax.xlane.f32.xlu0 %v1244_v47 }
 0x272   :  { %v1206_v11 = vpop.f32.mrf.mxu0 }
 0x273   :  { %v2769_v23 = vadd.f32 %v2756_v3, %v1206_v11 }
 0x275   :  { %v1247_v28 = vsel %vm591_vm0, %v2769_v23, -inf }
 0x276   :  { %1248 = vmax.xlane.f32.xlu1 %v1247_v28 }
 0x27a   :  { %v1208_v31 = vpop.f32.mrf.mxu0 }
 0x27b   :  { %v2774_v24 = vadd.f32 %v2756_v3, %v1208_v31 }
 0x27d   :  { %v1250_v44 = vsel %vm591_vm0, %v2774_v24, -inf }
 0x27e   :  { %1251 = vmax.xlane.f32.xlu1 %v1250_v44 }
 0x282   :  { %v1211_v12 = vpop.f32.mrf.mxu0 }
 0x283   :  { %v2779_v14 = vadd.f32 %v2756_v3, %v1211_v12 }
 0x285   :  { %v1253_v45 = vsel %vm591_vm0, %v2779_v14, -inf }
 0x286   :  { %1254 = vmax.xlane.f32.xlu2 %v1253_v45 }
 0x28a   :  { %v1213_v37 = vpop.f32.mrf.mxu0 }
 0x28b   :  { %v2784_v56 = vadd.f32 %v2756_v3, %v1213_v37 }
 0x28d   :  { %v1256_v15 = vsel %vm591_vm0, %v2784_v56, -inf }
 0x28e   :  { %1257 = vmax.xlane.f32.xlu2 %v1256_v15 }
 0x292   :  { %v1216_v17 = vpop.f32.mrf.mxu0 }
 0x293   :  { %v2789_v18 = vadd.f32 %v2756_v3, %v1216_v17 }
 0x295   :  { %v1259_v19 = vsel %vm591_vm0, %v2789_v18, -inf }
 0x296   :  { %1260 = vmax.xlane.f32.xlu0 %v1259_v19 }
 0x29a   :  { %v1218_v21 = vpop.f32.mrf.mxu0 }
 0x29b   :  { %v2794_v22 = vadd.f32 %v2756_v3, %v1218_v21 }
 0x29d   :  { %v1262_v26 = vsel %vm591_vm0, %v2794_v22, -inf }
 0x29e   :  { %1263 = vmax.xlane.f32.xlu1 %v1262_v26 }
 0x2a2   :  { %v1221_v27 = vpop.f32.mrf.mxu0 }
 0x2a3   :  { %v2799_v29 = vadd.f32 %v2756_v3, %v1221_v27 }
 0x2a5   :  { %v1265_v32 = vsel %vm591_vm0, %v2799_v29, -inf }
 0x2a6   :  { %1266 = vmax.xlane.f32.xlu2 %v1265_v32 }
 0x2aa   :  { %v1223_v33 = vpop.f32.mrf.mxu0 }
 0x2ab   :  { %v2804_v36 = vadd.f32 %v2756_v3, %v1223_v33 }
 0x2ad   :  { %v1268_v48 = vsel %vm591_vm0, %v2804_v36, -inf }
 0x2ae   :  { %1269 = vmax.xlane.f32.xlu0 %v1268_v48 }
 0x2b2   :  { %v1226_v57 = vpop.f32.mrf.mxu0 }
 0x2b3   :  { %v2809_v55 = vadd.f32 %v2756_v3, %v1226_v57 }
 0x2b5   :  { %v1271_v43 = vsel %vm591_vm0, %v2809_v55, -inf }
 0x2b6   :  { %1272 = vmax.xlane.f32.xlu1 %v1271_v43 }
 0x2ba   :  { %v1228_v38 = vpop.f32.mrf.mxu0 }
 0x2bb   :  { %v2814_v59 = vadd.f32 %v2756_v3, %v1228_v38 }
 0x2bd   :  { %v1274_v39 = vsel %vm591_vm0, %v2814_v59, -inf }
 0x2be   :  { %1275 = vmax.xlane.f32.xlu2 %v1274_v39 }
 0x2c2   :  { %v1231_v0 = vpop.f32.mrf.mxu0 }
 0x2c3   :  { %v2819_v40 = vadd.f32 %v2756_v3, %v1231_v0 }
 0x2c5   :  { %v1277_v41 = vsel %vm591_vm0, %v2819_v40, -inf }
 0x2c6   :  { %1278 = vmax.xlane.f32.xlu0 %v1277_v41 }
 0x2ca   :  { %v1233_v30 = vpop.f32.mrf.mxu0 }
 0x2cb   :  { %v2824_v42 = vadd.f32 %v2756_v3, %v1233_v30 }
 0x2cd   :  { %v1280_v46 = vsel %vm591_vm0, %v2824_v42, -inf }
 0x2ce   :  { %1281 = vmax.xlane.f32.xlu1 %v1280_v46 }
 0x2d2   :  { %v1236_v49 = vpop.f32.mrf.mxu0 }
 0x2d3   :  { %v2829_v50 = vadd.f32 %v2756_v3, %v1236_v49 }
 0x2d5   :  { %v1283_v51 = vsel %vm591_vm0, %v2829_v50, -inf }
 0x2d6   :  { %1284 = vmax.xlane.f32.xlu2 %v1283_v51 }
 0x2d9   :  { %v1243_v4 = vpop.xlane.xlu0 %1242 }
 0x2da   :  { %v1289_v54 = vsub.f32 %v2759_v6, %v1243_v4  ;;  %v1238_v52 = vpop.f32.mrf.mxu0 }
 0x2db   :  { %v2835_v53 = vadd.f32 %v2756_v3, %v1238_v52 }
 0x2dc   :  { %v1305_v9 = vmul.f32 1.442695, %v1289_v54 }
 0x2dd   :  { %v1286_v25 = vsel %vm591_vm0, %v2835_v53, -inf }
 0x2de   :  { %2005 = vpow2.f32 %v1305_v9  ;;  %1287 = vmax.xlane.f32.xlu0 %v1286_v25 }
 0x2e1   :  { %v1246_v58 = vpop.xlane.xlu0 %1245 }
 0x2e2   :  { %v1290_v10 = vsub.f32 %v2764_v8, %v1246_v58 }
 0x2e4   :  { %v2840_v13 = vpop.eup %2005  ;;  %v1307_v1 = vmul.f32 1.442695, %v1290_v10 }
 0x2e5   :  { %v1337_v20 = vsel %vm591_vm0, %v2840_v13, 0.0 }
 0x2e6   :  { %2007 = vpow2.f32 %v1307_v1  ;;  %1338 = vadd.xlane.f32.xlu1 %v1337_v20 }
 0x2e9   :  { %v1249_v60 = vpop.xlane.xlu1 %1248 }
 0x2ea   :  { %v1291_v16 = vsub.f32 %v2769_v23, %v1249_v60 }
 0x2ec   :  { %v2845_v61 = vpop.eup %2007  ;;  %v1309_v34 = vmul.f32 1.442695, %v1291_v16 }
 0x2ed   :  { %v1340_v62 = vsel %vm591_vm0, %v2845_v61, 0.0 }
 0x2ee   :  { %2009 = vpow2.f32 %v1309_v34  ;;  %1341 = vadd.xlane.f32.xlu2 %v1340_v62 }
 0x2f1   :  { %v1252_v63 = vpop.xlane.xlu1 %1251 }
 0x2f2   :  { %v1292_v2 = vsub.f32 %v2774_v24, %v1252_v63 }
 0x2f4   :  { %v2850_v3 = vpop.eup %2009  ;;  %v1311_v5 = vmul.f32 1.442695, %v1292_v2 }
 0x2f5   :  { %v1343_v6 = vsel %vm591_vm0, %v2850_v3, 0.0 }
 0x2f6   :  { %2011 = vpow2.f32 %v1311_v5  ;;  %1344 = vadd.xlane.f32.xlu0 %v1343_v6 }
 0x2f9   :  { %v1255_v7 = vpop.xlane.xlu2 %1254 }
 0x2fa   :  { %v1293_v35 = vsub.f32 %v2779_v14, %v1255_v7 }
 0x2fc   :  { %v2855_v8 = vpop.eup %2011  ;;  %v1313_v47 = vmul.f32 1.442695, %v1293_v35 }
 0x2fd   :  { %v1346_v11 = vsel %vm591_vm0, %v2855_v8, 0.0 }
 0x2fe   :  { %2013 = vpow2.f32 %v1313_v47  ;;  %1347 = vadd.xlane.f32.xlu1 %v1346_v11 }
 0x301   :  { %v1258_v23 = vpop.xlane.xlu2 %1257 }
 0x302   :  { %v1294_v28 = vsub.f32 %v2784_v56, %v1258_v23 }
 0x304   :  { %v2860_v31 = vpop.eup %2013  ;;  %v1315_v24 = vmul.f32 1.442695, %v1294_v28 }
 0x305   :  { %v1349_v44 = vsel %vm591_vm0, %v2860_v31, 0.0 }
 0x306   :  { %2015 = vpow2.f32 %v1315_v24  ;;  %1350 = vadd.xlane.f32.xlu2 %v1349_v44 }
 0x309   :  { %v1261_v12 = vpop.xlane.xlu0 %1260 }
 0x30a   :  { %v1295_v14 = vsub.f32 %v2789_v18, %v1261_v12 }
 0x30c   :  { %v2865_v45 = vpop.eup %2015  ;;  %v1317_v37 = vmul.f32 1.442695, %v1295_v14 }
 0x30d   :  { %v1352_v15 = vsel %vm591_vm0, %v2865_v45, 0.0 }
 0x30e   :  { %2017 = vpow2.f32 %v1317_v37  ;;  %1353 = vadd.xlane.f32.xlu0 %v1352_v15 }
 0x311   :  { %v1264_v56 = vpop.xlane.xlu1 %1263 }
 0x312   :  { %v1296_v17 = vsub.f32 %v2794_v22, %v1264_v56 }
 0x314   :  { %v2870_v19 = vpop.eup %2017  ;;  %v1319_v21 = vmul.f32 1.442695, %v1296_v17 }
 0x315   :  { %v1355_v26 = vsel %vm591_vm0, %v2870_v19, 0.0 }
 0x316   :  { %2019 = vpow2.f32 %v1319_v21  ;;  %1356 = vadd.xlane.f32.xlu1 %v1355_v26 }
 0x319   :  { %v1267_v18 = vpop.xlane.xlu2 %1266 }
 0x31a   :  { %v1297_v27 = vsub.f32 %v2799_v29, %v1267_v18 }
 0x31c   :  { %v2875_v32 = vpop.eup %2019  ;;  %v1321_v33 = vmul.f32 1.442695, %v1297_v27 }
 0x31d   :  { %v1358_v48 = vsel %vm591_vm0, %v2875_v32, 0.0 }
 0x31e   :  { %2021 = vpow2.f32 %v1321_v33  ;;  %1359 = vadd.xlane.f32.xlu2 %v1358_v48 }
 0x321   :  { %v1270_v22 = vpop.xlane.xlu0 %1269 }
 0x322   :  { %v1298_v57 = vsub.f32 %v2804_v36, %v1270_v22 }
 0x324   :  { %v2880_v43 = vpop.eup %2021  ;;  %v1323_v38 = vmul.f32 1.442695, %v1298_v57 }
 0x325   :  { %v1361_v39 = vsel %vm591_vm0, %v2880_v43, 0.0 }
 0x326   :  { %2023 = vpow2.f32 %v1323_v38  ;;  %1362 = vadd.xlane.f32.xlu0 %v1361_v39 }
 0x329   :  { %v1273_v29 = vpop.xlane.xlu1 %1272 }
 0x32a   :  { %v1299_v0 = vsub.f32 %v2809_v55, %v1273_v29 }
 0x32c   :  { %v2885_v41 = vpop.eup %2023  ;;  %v1325_v30 = vmul.f32 1.442695, %v1299_v0 }
 0x32d   :  { %v1364_v46 = vsel %vm591_vm0, %v2885_v41, 0.0 }
 0x32e   :  { %2025 = vpow2.f32 %v1325_v30  ;;  %1365 = vadd.xlane.f32.xlu1 %v1364_v46 }
 0x331   :  { %v1276_v36 = vpop.xlane.xlu2 %1275 }
 0x332   :  { %v1300_v49 = vsub.f32 %v2814_v59, %v1276_v36 }
 0x334   :  { %v2890_v51 = vpop.eup %2025  ;;  %v1327_v4 = vmul.f32 1.442695, %v1300_v49 }
 0x335   :  { %v1367_v54 = vsel %vm591_vm0, %v2890_v51, 0.0 }
 0x336   :  { %2027 = vpow2.f32 %v1327_v4  ;;  %1368 = vadd.xlane.f32.xlu2 %v1367_v54 }
 0x339   :  { %v1279_v55 = vpop.xlane.xlu0 %1278 }
 0x33a   :  { %v1301_v52 = vsub.f32 %v2819_v40, %v1279_v55 }
 0x33c   :  { %v2895_v9 = vpop.eup %2027  ;;  %v1329_v25 = vmul.f32 1.442695, %v1301_v52 }
 0x33d   :  { %v1370_v58 = vsel %vm591_vm0, %v2895_v9, 0.0 }
 0x33e   :  { %2029 = vpow2.f32 %v1329_v25  ;;  %1371 = vadd.xlane.f32.xlu0 %v1370_v58 }
 0x341   :  { %v1282_v59 = vpop.xlane.xlu1 %1281 }
 0x342   :  { %v1302_v10 = vsub.f32 %v2824_v42, %v1282_v59 }
 0x344   :  { %v2900_v1 = vpop.eup %2029  ;;  %v1331_v20 = vmul.f32 1.442695, %v1302_v10 }
 0x345   :  { %v1373_v60 = vsel %vm591_vm0, %v2900_v1, 0.0 }
 0x346   :  { %2031 = vpow2.f32 %v1331_v20  ;;  %1374 = vadd.xlane.f32.xlu1 %v1373_v60 }
 0x349   :  { %v1285_v40 = vpop.xlane.xlu2 %1284 }
 0x34a   :  { %v1303_v16 = vsub.f32 %v2829_v50, %v1285_v40 }
 0x34c   :  { %v2905_v34 = vpop.eup %2031  ;;  %v1333_v62 = vmul.f32 1.442695, %v1303_v16 }
 0x34d   :  { %v1376_v63 = vsel %vm591_vm0, %v2905_v34, 0.0 }
 0x34e   :  { %2033 = vpow2.f32 %v1333_v62  ;;  %1377 = vadd.xlane.f32.xlu2 %v1376_v63 }
 0x351   :  { %v1288_v42 = vpop.xlane.xlu0 %1287 }
 0x352   :  { %v1304_v2 = vsub.f32 %v2835_v53, %v1288_v42 }
 0x354   :  { %v2910_v5 = vpop.eup %2033  ;;  %v1335_v6 = vmul.f32 1.442695, %v1304_v2 }
 0x355   :  { %v1379_v7 = vsel %vm591_vm0, %v2910_v5, 0.0 }
 0x356   :  { %2035 = vpow2.f32 %v1335_v6  ;;  %1380 = vadd.xlane.f32.xlu0 %v1379_v7 }
 0x359   :  { %v1339_v50 = vpop.xlane.xlu1 %1338 }
 0x35a   :  { %2037 = vrcp.f32 %v1339_v50  ;;  %v1396_v24 = vand.u32 2147483648, %v1339_v50  ;;  %v1394_v12 = vand.u32 2147483647, %v1339_v50  ;;  %vm1390_vm2 = vweird.f32 %v1339_v50 }
 0x35c   :  { %v2914_v35 = vpop.eup %2035  ;;  %v1397_v15 = vor.u32 1.1754944e-38, %v1396_v24  ;;  %vm1395_vm4 = vcmp.eq.f32.partialorder %v1394_v12, 8.507059e+37 }
 0x35d   :  { %v1382_v47 = vsel %vm591_vm0, %v2914_v35, 0.0 }
 0x35e   :  { %1383 = vadd.xlane.f32.xlu1 %v1382_v47 }
 0x360   :  { %v2038_v11 = vpop.eup %2037 }
 0x361   :  { %v1386_v23 = vmul.f32 %v2038_v11, %v1339_v50  ;;  %v1342_v28 = vpop.xlane.xlu2 %1341  ;;  %vm1391_vm1 = vweird.f32 %v2038_v11 }
 0x362   :  { %2039 = vrcp.f32 %v1342_v28  ;;  %vm1392_vm3 = vmor %vm1390_vm2, %vm1391_vm1  ;;  %v1411_v33 = vand.u32 2147483648, %v1342_v28  ;;  %v1409_v22 = vand.u32 2147483647, %v1342_v28  ;;  %vm1405_vm6 = vweird.f32 %v1342_v28 }
 0x363   :  { %v1387_v53 = vsub.f32 1.0, %v1386_v23 }
 0x364   :  { %v1412_v39 = vor.u32 1.1754944e-38, %v1411_v33  ;;  %vm1410_vm8 = vcmp.eq.f32.partialorder %v1409_v22, 8.507059e+37 }
 0x365   :  { %v1388_v44 = vmul.f32 %v2038_v11, %v1387_v53 }
 0x367   :  { %v1389_v14 = vadd.f32 %v2038_v11, %v1388_v44 }
 0x368   :  { %v2040_v37 = vpop.eup %2039 }
 0x369   :  { %v1393_v56 = vsel %vm1392_vm3, %v2038_v11, %v1389_v14  ;;  %v1401_v17 = vmul.f32 %v2040_v37, %v1342_v28  ;;  %v1345_v21 = vpop.xlane.xlu0 %1344  ;;  %vm1406_vm5 = vweird.f32 %v2040_v37 }
 0x36a   :  { %v1398_v26 = vsel %vm1395_vm4, %v1397_v15, %v1393_v56  ;;  %2041 = vrcp.f32 %v1345_v21  ;;  %vm1407_vm7 = vmor %vm1405_vm6, %vm1406_vm5  ;;  %v1426_v49 = vand.u32 2147483648, %v1345_v21  ;;  %v1424_v54 = vand.u32 2147483647, %v1345_v21 }
 0x36b   :  { %v1399_v18 = vmul.f32 %v2840_v13, %v1398_v26  ;;  %v1402_v27 = vsub.f32 1.0, %v1401_v17  ;;  %vm1420_vm10 = vweird.f32 %v1345_v21 }
 0x36c   :  { %v1427_v25 = vor.u32 1.1754944e-38, %v1426_v49  ;;  %vm1425_vm12 = vcmp.eq.f32.partialorder %v1424_v54, 8.507059e+37 }
 0x36d   :  { %1625 = vst.msk [vmem:[%s3005_s7] sm:$0xff] %vm591_vm0, %v1399_v18  ;;  %v1403_v48 = vmul.f32 %v2040_v37, %v1402_v27 }
 0x36f   :  { %v1404_v57 = vadd.f32 %v2040_v37, %v1403_v48 }
 0x370   :  { %v2042_v38 = vpop.eup %2041 }
 0x371   :  { %v1408_v29 = vsel %vm1407_vm7, %v2040_v37, %v1404_v57  ;;  %v1416_v0 = vmul.f32 %v2042_v38, %v1345_v21  ;;  %v1348_v30 = vpop.xlane.xlu1 %1347  ;;  %vm1421_vm9 = vweird.f32 %v2042_v38 }
 0x372   :  { %v1413_v13 = vsel %vm1410_vm8, %v1412_v39, %v1408_v29  ;;  %2043 = vrcp.f32 %v1348_v30  ;;  %vm1422_vm11 = vmor %vm1420_vm10, %vm1421_vm9  ;;  %v1441_v40 = vand.u32 2147483648, %v1348_v30  ;;  %v1439_v62 = vand.u32 2147483647, %v1348_v30 }
 0x373   :  { %v1414_v46 = vmul.f32 %v2845_v61, %v1413_v13  ;;  %v1417_v36 = vsub.f32 1.0, %v1416_v0  ;;  %vm1435_vm14 = vweird.f32 %v1348_v30 }
 0x374   :  { %v1442_v2 = vor.u32 1.1754944e-38, %v1441_v40  ;;  %vm1440_vm1 = vcmp.eq.f32.partialorder %v1439_v62, 8.507059e+37 }
 0x375   :  { %1626 = vst.msk [vmem:[%s3005_s7 + $0x8] sm:$0xff] %vm591_vm0, %v1414_v46  ;;  %v1418_v4 = vmul.f32 %v2042_v38, %v1417_v36 }
 0x377   :  { %v1419_v55 = vadd.f32 %v2042_v38, %v1418_v4 }
 0x378   :  { %v2044_v52 = vpop.eup %2043 }
 0x379   :  { %v1423_v58 = vsel %vm1422_vm11, %v2042_v38, %v1419_v55  ;;  %v1431_v59 = vmul.f32 %v2044_v52, %v1348_v30  ;;  %v1351_v10 = vpop.xlane.xlu2 %1350  ;;  %vm1436_vm13 = vweird.f32 %v2044_v52 }
 0x37a   :  { %v1428_v61 = vsel %vm1425_vm12, %v1427_v25, %v1423_v58  ;;  %2045 = vrcp.f32 %v1351_v10  ;;  %vm1437_vm15 = vmor %vm1435_vm14, %vm1436_vm13  ;;  %v1456_v23 = vand.u32 2147483648, %v1351_v10  ;;  %v1454_v53 = vand.u32 2147483647, %v1351_v10 }
 0x37b   :  { %v1429_v20 = vmul.f32 %v2850_v3, %v1428_v61  ;;  %v1432_v60 = vsub.f32 1.0, %v1431_v59  ;;  %vm1450_vm3 = vweird.f32 %v1351_v10 }
 0x37c   :  { %v1457_v12 = vor.u32 1.1754944e-38, %v1456_v23  ;;  %vm1455_vm5 = vcmp.eq.f32.partialorder %v1454_v53, 8.507059e+37 }
 0x37d   :  { %1627 = vst.msk [vmem:[%s3005_s7 + $0x10] sm:$0xff] %vm591_vm0, %v1429_v20  ;;  %v1433_v16 = vmul.f32 %v2044_v52, %v1432_v60 }
 0x37f   :  { %v1434_v63 = vadd.f32 %v2044_v52, %v1433_v16 }
 0x380   :  { %v2046_v42 = vpop.eup %2045 }
 0x381   :  { %v1438_v6 = vsel %vm1437_vm15, %v2044_v52, %v1434_v63  ;;  %v1446_v7 = vmul.f32 %v2046_v42, %v1351_v10  ;;  %v1354_v50 = vpop.xlane.xlu0 %1353  ;;  %vm1451_vm2 = vweird.f32 %v2046_v42 }
 0x382   :  { %v1443_v3 = vsel %vm1440_vm1, %v1442_v2, %v1438_v6  ;;  %2047 = vrcp.f32 %v1354_v50  ;;  %vm1452_vm4 = vmor %vm1450_vm3, %vm1451_vm2  ;;  %v1471_v21 = vand.u32 2147483648, %v1354_v50  ;;  %v1469_v18 = vand.u32 2147483647, %v1354_v50 }
 0x383   :  { %v1444_v47 = vmul.f32 %v2855_v8, %v1443_v3  ;;  %v1447_v11 = vsub.f32 1.0, %v1446_v7  ;;  %vm1465_vm7 = vweird.f32 %v1354_v50 }
 0x384   :  { %v1472_v48 = vor.u32 1.1754944e-38, %v1471_v21  ;;  %vm1470_vm9 = vcmp.eq.f32.partialorder %v1469_v18, 8.507059e+37 }
 0x385   :  { %1628 = vst.msk [vmem:[%s3005_s7 + $0x18] sm:$0xff] %vm591_vm0, %v1444_v47  ;;  %v1448_v28 = vmul.f32 %v2046_v42, %v1447_v11 }
 0x387   :  { %v1449_v24 = vadd.f32 %v2046_v42, %v1448_v28 }
 0x388   :  { %v2048_v44 = vpop.eup %2047 }
 0x389   :  { %v1453_v14 = vsel %vm1452_vm4, %v2046_v42, %v1449_v24  ;;  %v1461_v37 = vmul.f32 %v2048_v44, %v1354_v50  ;;  %v1357_v15 = vpop.xlane.xlu1 %1356  ;;  %vm1466_vm6 = vweird.f32 %v2048_v44 }
 0x38a   :  { %v1458_v8 = vsel %vm1455_vm5, %v1457_v12, %v1453_v14  ;;  %2049 = vrcp.f32 %v1357_v15  ;;  %vm1467_vm8 = vmor %vm1465_vm7, %vm1466_vm6  ;;  %v1486_v0 = vand.u32 2147483648, %v1357_v15  ;;  %v1484_v13 = vand.u32 2147483647, %v1357_v15 }
 0x38b   :  { %v1459_v56 = vmul.f32 %v2860_v31, %v1458_v8  ;;  %v1462_v17 = vsub.f32 1.0, %v1461_v37  ;;  %vm1480_vm11 = vweird.f32 %v1357_v15 }
 0x38c   :  { %v1487_v49 = vor.u32 1.1754944e-38, %v1486_v0  ;;  %vm1485_vm13 = vcmp.eq.f32.partialorder %v1484_v13, 8.507059e+37 }
 0x38d   :  { %1629 = vst.msk [vmem:[%s3005_s7 + $0x20] sm:$0xff] %vm591_vm0, %v1459_v56  ;;  %v1463_v26 = vmul.f32 %v2048_v44, %v1462_v17 }
 0x38f   :  { %v1464_v27 = vadd.f32 %v2048_v44, %v1463_v26 }
 0x390   :  { %v2050_v33 = vpop.eup %2049 }
 0x391   :  { %v1468_v22 = vsel %vm1467_vm8, %v2048_v44, %v1464_v27  ;;  %v1476_v57 = vmul.f32 %v2050_v33, %v1357_v15  ;;  %v1360_v38 = vpop.xlane.xlu2 %1359  ;;  %vm1481_vm10 = vweird.f32 %v2050_v33 }
 0x392   :  { %v1473_v31 = vsel %vm1470_vm9, %v1472_v48, %v1468_v22  ;;  %2051 = vrcp.f32 %v1360_v38  ;;  %vm1482_vm12 = vmor %vm1480_vm11, %vm1481_vm10  ;;  %v1501_v58 = vand.u32 2147483648, %v1360_v38  ;;  %v1499_v10 = vand.u32 2147483647, %v1360_v38 }
 0x393   :  { %v1474_v39 = vmul.f32 %v2865_v45, %v1473_v31  ;;  %v1477_v29 = vsub.f32 1.0, %v1476_v57  ;;  %vm1495_vm15 = vweird.f32 %v1360_v38 }
 0x394   :  { %v1502_v60 = vor.u32 1.1754944e-38, %v1501_v58  ;;  %vm1500_vm2 = vcmp.eq.f32.partialorder %v1499_v10, 8.507059e+37 }
 0x395   :  { %1630 = vst.msk [vmem:[%s3005_s7 + $0x28] sm:$0xff] %vm591_vm0, %v1474_v39  ;;  %v1478_v30 = vmul.f32 %v2050_v33, %v1477_v29 }
 0x397   :  { %v1479_v46 = vadd.f32 %v2050_v33, %v1478_v30 }
 0x398   :  { %v2052_v36 = vpop.eup %2051 }
 0x399   :  { %v1483_v4 = vsel %vm1482_vm12, %v2050_v33, %v1479_v46  ;;  %v1491_v54 = vmul.f32 %v2052_v36, %v1360_v38  ;;  %v1363_v55 = vpop.xlane.xlu0 %1362  ;;  %vm1496_vm14 = vweird.f32 %v2052_v36 }
 0x39a   :  { %v1488_v45 = vsel %vm1485_vm13, %v1487_v49, %v1483_v4  ;;  %2053 = vrcp.f32 %v1363_v55  ;;  %vm1497_vm1 = vmor %vm1495_vm15, %vm1496_vm14  ;;  %v1516_v2 = vand.u32 2147483648, %v1363_v55  ;;  %v1514_v7 = vand.u32 2147483647, %v1363_v55 }
 0x39b   :  { %v1489_v52 = vmul.f32 %v2870_v19, %v1488_v45  ;;  %v1492_v25 = vsub.f32 1.0, %v1491_v54  ;;  %vm1510_vm4 = vweird.f32 %v1363_v55 }
 0x39c   :  { %v1517_v47 = vor.u32 1.1754944e-38, %v1516_v2  ;;  %vm1515_vm6 = vcmp.eq.f32.partialorder %v1514_v7, 8.507059e+37 }
 0x39d   :  { %1631 = vst.msk [vmem:[%s3005_s7 + $0x30] sm:$0xff] %vm591_vm0, %v1489_v52  ;;  %v1493_v59 = vmul.f32 %v2052_v36, %v1492_v25 }
 0x39f   :  { %v1494_v61 = vadd.f32 %v2052_v36, %v1493_v59 }
 0x3a0   :  { %v2054_v20 = vpop.eup %2053 }
 0x3a1   :  { %v1498_v40 = vsel %vm1497_vm1, %v2052_v36, %v1494_v61  ;;  %v1506_v16 = vmul.f32 %v2054_v20, %v1363_v55  ;;  %v1366_v62 = vpop.xlane.xlu1 %1365  ;;  %vm1511_vm3 = vweird.f32 %v2054_v20 }
 0x3a2   :  { %v1503_v19 = vsel %vm1500_vm2, %v1502_v60, %v1498_v40  ;;  %2055 = vrcp.f32 %v1366_v62  ;;  %vm1512_vm5 = vmor %vm1510_vm4, %vm1511_vm3  ;;  %v1531_v44 = vand.u32 2147483648, %v1366_v62  ;;  %v1529_v14 = vand.u32 2147483647, %v1366_v62 }
 0x3a3   :  { %v1504_v63 = vmul.f32 %v2875_v32, %v1503_v19  ;;  %v1507_v42 = vsub.f32 1.0, %v1506_v16  ;;  %vm1525_vm8 = vweird.f32 %v1366_v62 }
 0x3a4   :  { %v1532_v8 = vor.u32 1.1754944e-38, %v1531_v44  ;;  %vm1530_vm10 = vcmp.eq.f32.partialorder %v1529_v14, 8.507059e+37 }
 0x3a5   :  { %1632 = vst.msk [vmem:[%s3005_s7 + $0x38] sm:$0xff] %vm591_vm0, %v1504_v63  ;;  %v1508_v6 = vmul.f32 %v2054_v20, %v1507_v42 }
 0x3a7   :  { %v1509_v50 = vadd.f32 %v2054_v20, %v1508_v6 }
 0x3a8   :  { %v2056_v3 = vpop.eup %2055 }
 0x3a9   :  { %v1513_v11 = vsel %vm1512_vm5, %v2054_v20, %v1509_v50  ;;  %v1521_v23 = vmul.f32 %v2056_v3, %v1366_v62  ;;  %v1369_v28 = vpop.xlane.xlu2 %1368  ;;  %vm1526_vm7 = vweird.f32 %v2056_v3 }
 0x3aa   :  { %v1518_v32 = vsel %vm1515_vm6, %v1517_v47, %v1513_v11  ;;  %2057 = vrcp.f32 %v1369_v28  ;;  %vm1527_vm9 = vmor %vm1525_vm8, %vm1526_vm7  ;;  %v1546_v27 = vand.u32 2147483648, %v1369_v28  ;;  %v1544_v48 = vand.u32 2147483647, %v1369_v28 }
 0x3ab   :  { %v1519_v53 = vmul.f32 %v2880_v43, %v1518_v32  ;;  %v1522_v24 = vsub.f32 1.0, %v1521_v23  ;;  %vm1540_vm12 = vweird.f32 %v1369_v28 }
 0x3ac   :  { %v1547_v38 = vor.u32 1.1754944e-38, %v1546_v27  ;;  %vm1545_vm14 = vcmp.eq.f32.partialorder %v1544_v48, 8.507059e+37 }
 0x3ad   :  { %1633 = vst.msk [vmem:[%s3005_s7 + $0x40] sm:$0xff] %vm591_vm0, %v1519_v53  ;;  %v1523_v12 = vmul.f32 %v2056_v3, %v1522_v24 }
 0x3af   :  { %v1524_v37 = vadd.f32 %v2056_v3, %v1523_v12 }
 0x3b0   :  { %v2058_v15 = vpop.eup %2057 }
 0x3b1   :  { %v1528_v56 = vsel %vm1527_vm9, %v2056_v3, %v1524_v37  ;;  %v1536_v17 = vmul.f32 %v2058_v15, %v1369_v28  ;;  %v1372_v21 = vpop.xlane.xlu0 %1371  ;;  %vm1541_vm11 = vweird.f32 %v2058_v15 }
 0x3b2   :  { %v1533_v43 = vsel %vm1530_vm10, %v1532_v8, %v1528_v56  ;;  %2059 = vrcp.f32 %v1372_v21  ;;  %vm1542_vm13 = vmor %vm1540_vm12, %vm1541_vm11  ;;  %v1561_v13 = vand.u32 2147483648, %v1372_v21  ;;  %v1559_v36 = vand.u32 2147483647, %v1372_v21 }
 0x3b3   :  { %v1534_v26 = vmul.f32 %v2885_v41, %v1533_v43  ;;  %v1537_v18 = vsub.f32 1.0, %v1536_v17  ;;  %vm1555_vm1 = vweird.f32 %v1372_v21 }
 0x3b4   :  { %v1562_v54 = vor.u32 1.1754944e-38, %v1561_v13  ;;  %vm1560_vm3 = vcmp.eq.f32.partialorder %v1559_v36, 8.507059e+37 }
 0x3b5   :  { %1634 = vst.msk [vmem:[%s3005_s7 + $0x48] sm:$0xff] %vm591_vm0, %v1534_v26  ;;  %v1538_v33 = vmul.f32 %v2058_v15, %v1537_v18 }
 0x3b7   :  { %v1539_v22 = vadd.f32 %v2058_v15, %v1538_v33 }
 0x3b8   :  { %v2060_v57 = vpop.eup %2059 }
 0x3b9   :  { %v1543_v31 = vsel %vm1542_vm13, %v2058_v15, %v1539_v22  ;;  %v1551_v39 = vmul.f32 %v2060_v57, %v1372_v21  ;;  %v1375_v29 = vpop.xlane.xlu1 %1374  ;;  %vm1556_vm15 = vweird.f32 %v2060_v57 }
 0x3ba   :  { %v1548_v41 = vsel %vm1545_vm14, %v1547_v38, %v1543_v31  ;;  %2061 = vrcp.f32 %v1375_v29  ;;  %vm1557_vm2 = vmor %vm1555_vm1, %vm1556_vm15  ;;  %v1576_v59 = vand.u32 2147483648, %v1375_v29  ;;  %v1574_v61 = vand.u32 2147483647, %v1375_v29 }
 0x3bb   :  { %v1549_v0 = vmul.f32 %v2890_v51, %v1548_v41  ;;  %v1552_v30 = vsub.f32 1.0, %v1551_v39  ;;  %vm1570_vm5 = vweird.f32 %v1375_v29 }
 0x3bc   :  { %v1577_v40 = vor.u32 1.1754944e-38, %v1576_v59  ;;  %vm1575_vm7 = vcmp.eq.f32.partialorder %v1574_v61, 8.507059e+37 }
 0x3bd   :  { %1635 = vst.msk [vmem:[%s3005_s7 + $0x50] sm:$0xff] %vm591_vm0, %v1549_v0  ;;  %v1553_v46 = vmul.f32 %v2060_v57, %v1552_v30 }
 0x3bf   :  { %v1554_v49 = vadd.f32 %v2060_v57, %v1553_v46 }
 0x3c0   :  { %v2062_v4 = vpop.eup %2061 }
 0x3c1   :  { %v1558_v55 = vsel %vm1557_vm2, %v2060_v57, %v1554_v49  ;;  %v1566_v45 = vmul.f32 %v2062_v4, %v1375_v29  ;;  %v1378_v52 = vpop.xlane.xlu2 %1377  ;;  %vm1571_vm4 = vweird.f32 %v2062_v4 }
 0x3c2   :  { %v1563_v51 = vsel %vm1560_vm3, %v1562_v54, %v1558_v55  ;;  %2063 = vrcp.f32 %v1378_v52  ;;  %vm1572_vm6 = vmor %vm1570_vm5, %vm1571_vm4  ;;  %v1591_v2 = vand.u32 2147483648, %v1378_v52  ;;  %v1589_v7 = vand.u32 2147483647, %v1378_v52 }
 0x3c3   :  { %v1564_v25 = vmul.f32 %v2895_v9, %v1563_v51  ;;  %v1567_v58 = vsub.f32 1.0, %v1566_v45  ;;  %vm1585_vm9 = vweird.f32 %v1378_v52 }
 0x3c4   :  { %v1592_v47 = vor.u32 1.1754944e-38, %v1591_v2  ;;  %vm1590_vm11 = vcmp.eq.f32.partialorder %v1589_v7, 8.507059e+37 }
 0x3c5   :  { %1636 = vst.msk [vmem:[%s3005_s7 + $0x58] sm:$0xff] %vm591_vm0, %v1564_v25  ;;  %v1568_v10 = vmul.f32 %v2062_v4, %v1567_v58 }
 0x3c7   :  { %v1569_v20 = vadd.f32 %v2062_v4, %v1568_v10 }
 0x3c8   :  { %v2064_v60 = vpop.eup %2063 }
 0x3c9   :  { %v1573_v16 = vsel %vm1572_vm6, %v2062_v4, %v1569_v20  ;;  %v1581_v62 = vmul.f32 %v2064_v60, %v1378_v52  ;;  %v1381_v19 = vpop.xlane.xlu0 %1380  ;;  %vm1586_vm8 = vweird.f32 %v2064_v60 }
 0x3ca   :  { %v1578_v9 = vsel %vm1575_vm7, %v1577_v40, %v1573_v16  ;;  %2065 = vrcp.f32 %v1381_v19  ;;  %vm1587_vm10 = vmor %vm1585_vm9, %vm1586_vm8  ;;  %v1606_v24 = vand.u32 2147483648, %v1381_v19  ;;  %v1604_v12 = vand.u32 2147483647, %v1381_v19 }
 0x3cb   :  { %v1579_v63 = vmul.f32 %v2900_v1, %v1578_v9  ;;  %v1582_v42 = vsub.f32 1.0, %v1581_v62  ;;  %vm1600_vm13 = vweird.f32 %v1381_v19 }
 0x3cc   :  { %v1607_v15 = vor.u32 1.1754944e-38, %v1606_v24  ;;  %vm1605_vm15 = vcmp.eq.f32.partialorder %v1604_v12, 8.507059e+37 }
 0x3cd   :  { %1637 = vst.msk [vmem:[%s3005_s7 + $0x60] sm:$0xff] %vm591_vm0, %v1579_v63  ;;  %v1583_v6 = vmul.f32 %v2064_v60, %v1582_v42 }
 0x3cf   :  { %v1584_v50 = vadd.f32 %v2064_v60, %v1583_v6 }
 0x3d0   :  { %v2066_v3 = vpop.eup %2065 }
 0x3d1   :  { %v1588_v11 = vsel %vm1587_vm10, %v2064_v60, %v1584_v50  ;;  %v1596_v23 = vmul.f32 %v2066_v3, %v1381_v19  ;;  %v1384_v28 = vpop.xlane.xlu1 %1383  ;;  %vm1601_vm12 = vweird.f32 %v2066_v3 }
 0x3d2   :  { %v1593_v1 = vsel %vm1590_vm11, %v1592_v47, %v1588_v11  ;;  %2067 = vrcp.f32 %v1384_v28  ;;  %vm1602_vm14 = vmor %vm1600_vm13, %vm1601_vm12  ;;  %v1621_v43 = vand.u32 2147483648, %v1384_v28  ;;  %v1619_v18 = vand.u32 2147483647, %v1384_v28 }
 0x3d3   :  { %v1594_v32 = vmul.f32 %v2905_v34, %v1593_v1  ;;  %v1597_v53 = vsub.f32 1.0, %v1596_v23  ;;  %vm1615_vm2 = vweird.f32 %v1384_v28 }
 0x3d4   :  { %v1622_v33 = vor.u32 1.1754944e-38, %v1621_v43  ;;  %vm1620_vm4 = vcmp.eq.f32.partialorder %v1619_v18, 8.507059e+37 }
 0x3d5   :  { %1638 = vst.msk [vmem:[%s3005_s7 + $0x68] sm:$0xff] %vm591_vm0, %v1594_v32  ;;  %v1598_v44 = vmul.f32 %v2066_v3, %v1597_v53 }
 0x3d7   :  { %v1599_v14 = vadd.f32 %v2066_v3, %v1598_v44 }
 0x3d8   :  { %v2068_v37 = vpop.eup %2067 }
 0x3d9   :  { %v1603_v8 = vsel %vm1602_vm14, %v2066_v3, %v1599_v14  ;;  %v1611_v56 = vmul.f32 %v2068_v37, %v1384_v28  ;;  %vm1616_vm1 = vweird.f32 %v2068_v37 }
 0x3da   :  { %v1608_v17 = vsel %vm1605_vm15, %v1607_v15, %v1603_v8  ;;  %vm1617_vm3 = vmor %vm1615_vm2, %vm1616_vm1 }
 0x3db   :  { %v1609_v34 = vmul.f32 %v2910_v5, %v1608_v17  ;;  %v1612_v21 = vsub.f32 1.0, %v1611_v56 }
 0x3dd   :  { %1639 = vst.msk [vmem:[%s3005_s7 + $0x70] sm:$0xff] %vm591_vm0, %v1609_v34  ;;  %v1613_v26 = vmul.f32 %v2068_v37, %v1612_v21 }
 0x3df   :  { %v1614_v27 = vadd.f32 %v2068_v37, %v1613_v26 }
 0x3e1   :  { %v1618_v48 = vsel %vm1617_vm3, %v2068_v37, %v1614_v27 }
 0x3e2   :  { %v1623_v22 = vsel %vm1620_vm4, %v1622_v33, %v1618_v48 }
 0x3e3   :  { %v1624_v57 = vmul.f32 %v2914_v35, %v1623_v22 }
 0x3e5   :  { %1640 = vst.msk [vmem:[%s3005_s7 + $0x78] sm:$0xff] %vm591_vm0, %v1624_v57 }

</bundles_post_ra>
